<compile_context>
chip_gen: v7x
topology: tpu7x:2x2x1
jax: 0.10.0
libtpu: 0.0.40
codegen_flags: <defaults>
</compile_context>

<pallas_src>
import functools

import jax
import jax.numpy as jnp
from jax.experimental import pallas as pl
from jax.experimental.pallas import tpu as pltpu


def _round_up(x, m):
    return ((x + m - 1) // m) * m


def _mlp_kernel(x_ref, w1_ref, b1_ref, w2_ref, b2_ref, o_ref):
    # First linear: (tb, D_in)bf16 @ (D_in, H)bf16 -> f32 accumulator (MXU).
    h = jnp.dot(x_ref[...], w1_ref[...], preferred_element_type=jnp.float32)
    # Bias + ReLU in f32 on the VPU.
    h = jnp.maximum(h + b1_ref[...], 0.0)
    # Second linear: cast activations to bf16 for the MXU, accumulate in f32.
    y = jnp.dot(h.astype(jnp.bfloat16), w2_ref[...],
                preferred_element_type=jnp.float32)
    # Bias add in f32, single cast to the output dtype.
    o_ref[...] = (y + b2_ref[...]).astype(o_ref.dtype)


@functools.partial(jax.jit, static_argnames=("batch_tile",))
def embedding_encoder_forward(x, w1, b1, w2, b2, batch_tile=256):
    """Fused Linear -> ReLU -> Linear.

    Args:
      x:  (B, D_in)  float32
      w1: (D_in, H)  float32     b1: (1, H)     float32
      w2: (H, D_out) float32     b2: (1, D_out) float32
      batch_tile: rows per grid step (default 256; multiple of 128 recommended).
    Returns:
      (B, D_out) float32
    """
    B, d_in = x.shape
    h_dim = w1.shape[1]
    d_out = w2.shape[1]

    # Clamp the tile for small batches (keep a multiple of 8 sublanes), then
    # pad the batch up to a whole number of tiles (no divisibility assert).
    tile = min(batch_tile, _round_up(B, 8))
    b_pad = _round_up(B, tile)

    # bf16 operands for the MXU; biases stay f32 for the VPU epilogue.
    x_bf = x.astype(jnp.bfloat16)
    if b_pad != B:
        x_bf = jnp.pad(x_bf, ((0, b_pad - B), (0, 0)))
    w1_bf = w1.astype(jnp.bfloat16)
    w2_bf = w2.astype(jnp.bfloat16)
    b1_f32 = b1.astype(jnp.float32)
    b2_f32 = b2.astype(jnp.float32)

    grid = (b_pad // tile,)

    out = pl.pallas_call(
        _mlp_kernel,
        out_shape=jax.ShapeDtypeStruct((b_pad, d_out), jnp.float32),
        grid_spec=pltpu.PrefetchScalarGridSpec(
            num_scalar_prefetch=0,
            grid=grid,
            in_specs=[
                # x tile streams along the batch grid axis.
                pl.BlockSpec((tile, d_in), lambda i: (i, 0)),
                # Weights / biases are VMEM-resident (constant block index).
                pl.BlockSpec((d_in, h_dim), lambda i: (0, 0)),
                pl.BlockSpec((1, h_dim), lambda i: (0, 0)),
                pl.BlockSpec((h_dim, d_out), lambda i: (0, 0)),
                pl.BlockSpec((1, d_out), lambda i: (0, 0)),
            ],
            out_specs=pl.BlockSpec((tile, d_out), lambda i: (i, 0)),
        ),
        compiler_params=pltpu.CompilerParams(
            # Batch axis is embarrassingly parallel -> megacore sharding on v7x.
            dimension_semantics=("parallel",),
        ),
    )(x_bf, w1_bf, b1_f32, w2_bf, b2_f32)

    return out[:B]


def init_params(key, input_size=768, hidden_size=768, output_size=512):
    """Deterministic init mimicking nn.Linear's U(-1/sqrt(fan_in), 1/sqrt(fan_in))."""
    k1, k2, k3, k4 = jax.random.split(key, 4)
    bound1 = 1.0 / jnp.sqrt(jnp.float32(input_size))
    bound2 = 1.0 / jnp.sqrt(jnp.float32(hidden_size))
    # Stored as (in_features, out_features) so the kernel does x @ W.
    w1 = jax.random.uniform(k1, (input_size, hidden_size), jnp.float32,
                            -bound1, bound1)
    b1 = jax.random.uniform(k2, (1, hidden_size), jnp.float32, -bound1, bound1)
    w2 = jax.random.uniform(k3, (hidden_size, output_size), jnp.float32,
                            -bound2, bound2)
    b2 = jax.random.uniform(k4, (1, output_size), jnp.float32, -bound2, bound2)
    return w1, b1, w2, b2


if __name__ == "__main__":
    INPUT_SIZE = 768    # fixed by the module
    HIDDEN_SIZE = 768   # nn.Linear(input_size, 768)
    OUTPUT_SIZE = 512
    BATCH = 40          # deliberately NOT a tile multiple -> exercises padding path

    key = jax.random.PRNGKey(0)
    k_x, k_p = jax.random.split(key)

    x = jax.random.normal(k_x, (BATCH, INPUT_SIZE), jnp.float32)
    w1, b1, w2, b2 = init_params(k_p, INPUT_SIZE, HIDDEN_SIZE, OUTPUT_SIZE)

    # Small tile for the demo so the grid has several steps; production
    # callers should use the default batch_tile=256.
    out = embedding_encoder_forward(x, w1, b1, w2, b2, batch_tile=16)
    out = jax.block_until_ready(out)
    assert out.shape == (BATCH, OUTPUT_SIZE)

    # Tight check against a pure-JAX reference mirroring the kernel's
    # bf16-operand / f32-accumulate numerics.
    xb = x.astype(jnp.bfloat16).astype(jnp.float32)
    w1b = w1.astype(jnp.bfloat16).astype(jnp.float32)
    w2b = w2.astype(jnp.bfloat16).astype(jnp.float32)
    h_ref = jnp.maximum(xb @ w1b + b1, 0.0)
    ref_bf = h_ref.astype(jnp.bfloat16).astype(jnp.float32) @ w2b + b2
    assert jnp.allclose(out, ref_bf, atol=2e-3, rtol=2e-3), "mismatch vs bf16 reference"

    # Loose sanity check against the full-precision (PyTorch-semantics) reference.
    ref_f32 = jnp.maximum(x @ w1 + b1, 0.0) @ w2 + b2
    assert jnp.allclose(out, ref_f32, atol=5e-2, rtol=5e-2), "mismatch vs f32 reference"

    print("KERNEL_OK")
</pallas_src>

<mosaic_0001>
module attributes {stable_mosaic.version = 11 : i64} {
  func.func @_mlp_kernel(%arg0: i32, %arg1: memref<16x768xbf16, #tpu.memory_space<vmem>>, %arg2: memref<768x768xbf16, #tpu.memory_space<vmem>>, %arg3: memref<1x768xf32, #tpu.memory_space<vmem>>, %arg4: memref<768x512xbf16, #tpu.memory_space<vmem>>, %arg5: memref<1x512xf32, #tpu.memory_space<vmem>>, %arg6: memref<16x512xf32, #tpu.memory_space<vmem>>) attributes {dimension_semantics = [#tpu.dimension_semantics<parallel>], iteration_bounds = array<i64: 3>, scalar_prefetch = 0 : i64, scratch_operands = 0 : i64, tpu.core_type = #tpu.core_type<tc>, window_params = [{transform_indices = @transform_0, window_bounds = array<i64: 16, 768>}, {pipeline_mode = #tpu.pipeline_mode<synchronous>, transform_indices = @transform_1, window_bounds = array<i64: 768, 768>}, {pipeline_mode = #tpu.pipeline_mode<synchronous>, transform_indices = @transform_2, window_bounds = array<i64: 1, 768>}, {pipeline_mode = #tpu.pipeline_mode<synchronous>, transform_indices = @transform_3, window_bounds = array<i64: 768, 512>}, {pipeline_mode = #tpu.pipeline_mode<synchronous>, transform_indices = @transform_4, window_bounds = array<i64: 1, 512>}, {transform_indices = @transform_5, window_bounds = array<i64: 16, 512>}]} {
    %c0 = arith.constant 0 : index
    %c0_0 = arith.constant 0 : index
    %0 = vector.load %arg1[%c0, %c0_0] : memref<16x768xbf16, #tpu.memory_space<vmem>>, vector<16x768xbf16>
    %c0_1 = arith.constant 0 : index
    %c0_2 = arith.constant 0 : index
    %1 = vector.load %arg2[%c0_1, %c0_2] : memref<768x768xbf16, #tpu.memory_space<vmem>>, vector<768x768xbf16>
    %cst = arith.constant dense<0.000000e+00> : vector<16x768xf32>
    %2 = tpu.matmul %0, %1, %cst {dimension_numbers = #tpu.dot_dimension_numbers<[1], [0], [0], [1], [0, 0, 1, 1], [], []>} : vector<16x768xbf16>, vector<768x768xbf16>, vector<16x768xf32> -> vector<16x768xf32>
    %c0_3 = arith.constant 0 : index
    %c0_4 = arith.constant 0 : index
    %3 = vector.load %arg3[%c0_3, %c0_4] : memref<1x768xf32, #tpu.memory_space<vmem>>, vector<1x768xf32>
    %4 = vector.broadcast %3 : vector<1x768xf32> to vector<16x768xf32>
    %5 = arith.addf %2, %4 : vector<16x768xf32>
    %cst_5 = arith.constant 0.000000e+00 : f32
    %6 = vector.broadcast %cst_5 : f32 to vector<16x768xf32>
    %7 = arith.maximumf %5, %6 : vector<16x768xf32>
    %8 = arith.truncf %7 : vector<16x768xf32> to vector<16x768xbf16>
    %c0_6 = arith.constant 0 : index
    %c0_7 = arith.constant 0 : index
    %9 = vector.load %arg4[%c0_6, %c0_7] : memref<768x512xbf16, #tpu.memory_space<vmem>>, vector<768x512xbf16>
    %cst_8 = arith.constant dense<0.000000e+00> : vector<16x512xf32>
    %10 = tpu.matmul %8, %9, %cst_8 {dimension_numbers = #tpu.dot_dimension_numbers<[1], [0], [0], [1], [0, 0, 1, 1], [], []>} : vector<16x768xbf16>, vector<768x512xbf16>, vector<16x512xf32> -> vector<16x512xf32>
    %c0_9 = arith.constant 0 : index
    %c0_10 = arith.constant 0 : index
    %11 = vector.load %arg5[%c0_9, %c0_10] : memref<1x512xf32, #tpu.memory_space<vmem>>, vector<1x512xf32>
    %12 = vector.broadcast %11 : vector<1x512xf32> to vector<16x512xf32>
    %13 = arith.addf %10, %12 : vector<16x512xf32>
    %c0_11 = arith.constant 0 : index
    %c0_12 = arith.constant 0 : index
    %14 = vector.load %arg6[%c0_11, %c0_12] : memref<16x512xf32, #tpu.memory_space<vmem>>, vector<16x512xf32>
    tpu.vector_store %arg6[%c0_11, %c0_12], %13 {strides = array<i32>} : memref<16x512xf32, #tpu.memory_space<vmem>>, vector<16x512xf32>,
    return
  }
  func.func @transform_0(%arg0: i32) -> (i32, i32) {
    %c0_i32 = arith.constant 0 : i32
    %c0_i32_0 = arith.constant 0 : i32
    return %arg0, %c0_i32 : i32, i32
  }
  func.func @transform_1(%arg0: i32) -> (i32, i32) {
    %c0_i32 = arith.constant 0 : i32
    %c0_i32_0 = arith.constant 0 : i32
    %c0_i32_1 = arith.constant 0 : i32
    return %c0_i32, %c0_i32_0 : i32, i32
  }
  func.func @transform_2(%arg0: i32) -> (i32, i32) {
    %c0_i32 = arith.constant 0 : i32
    %c0_i32_0 = arith.constant 0 : i32
    %c0_i32_1 = arith.constant 0 : i32
    return %c0_i32, %c0_i32_0 : i32, i32
  }
  func.func @transform_3(%arg0: i32) -> (i32, i32) {
    %c0_i32 = arith.constant 0 : i32
    %c0_i32_0 = arith.constant 0 : i32
    %c0_i32_1 = arith.constant 0 : i32
    return %c0_i32, %c0_i32_0 : i32, i32
  }
  func.func @transform_4(%arg0: i32) -> (i32, i32) {
    %c0_i32 = arith.constant 0 : i32
    %c0_i32_0 = arith.constant 0 : i32
    %c0_i32_1 = arith.constant 0 : i32
    return %c0_i32, %c0_i32_0 : i32, i32
  }
  func.func @transform_5(%arg0: i32) -> (i32, i32) {
    %c0_i32 = arith.constant 0 : i32
    %c0_i32_0 = arith.constant 0 : i32
    return %arg0, %c0_i32 : i32, i32
  }
}

</mosaic_0001>

<bundles_post_ra>
// kernel: embedding_encoder_forward.1
= control target key start
LH: loop header
LB: loop body
LE: loop exit
PB: predicated region body
PF: predicated region fallthrough
CT: control target
= control target key end

     0   :  { %s5271_s18 = smov 0   ;;  %s6826_s0 = inlined_call_operand.vmem [shape: bf16[48,768], index: 0, kind: input, shape index: {}]   ;;  %s6827_s1 = inlined_call_operand.vmem [shape: bf16[768,768], index: 1, kind: input, shape index: {}]   ;;  %s6828_s2 = inlined_call_operand.vmem [shape: f32[1,768], index: 2, kind: input, shape index: {}]   ;;  %s6829_s3 = inlined_call_operand.vmem [shape: bf16[768,512], index: 3, kind: input, shape index: {}]   ;;  %s6830_s4 = inlined_call_operand.vmem [shape: f32[1,512], index: 4, kind: input, shape index: {}]   ;;  %s6831_s5 = inlined_call_operand.vmem [shape: f32[48,512], index: 5, kind: output, shape index: {}]  }
   0x1 LB: > { %s3932_s19 = sadd.s32 4294967295, %s5239_s18   ;;  %p3936_p0 = scmp.ge.s32.totalorder %s5239_s18, 1  ;;  %s5239_s18 = sphi %s5271_s18, %s15_s18  }
   0x2   : > { %p189_p1 = scmp.lt.s32.totalorder %s5239_s18, 4 }
   0x4   : > { %p190_p2 = pnand %p3936_p0, %p189_p1 }
   0x5   : > { %v4500_v0 = vld [vmem:[%s6827_s1 + $0x4] ss:$24 sps:$4 sm:$0xff] (!%p190_p2)   ;;  %v4504_v2 = vld [vmem:[%s6827_s1] ss:$24 sps:$4 sm:$0xff] (!%p190_p2)   ;;  %v4506_v4 = vld [vmem:[%s6827_s1 + $0x34] ss:$24 sps:$4 sm:$0xff] (!%p190_p2)  }
   0x6   : > { %193 = sbr.rel (%p190_p2) target bundleno = 767 (0x2ff), region = 40  ;;  %v4502_v1 = vld [vmem:[%s6827_s1 + $0x304] ss:$24 sps:$4 sm:$0xff] (!%p190_p2)   ;;  %2029 = vmatprep.subr.bf16.mxu1 (!%p190_p2), %v4500_v0  ;;  %v4505_v3 = vld [vmem:[%s6827_s1 + $0x300] ss:$24 sps:$4 sm:$0xff] (!%p190_p2)   ;;  %s3937_s9 = sshll.u32 (!%p190_p2), %s3932_s19, 1 }
   0x7   : > { %2072 = vmatprep.subr.bf16.mxu0 (!%p190_p2), %v4502_v1  ;;  %2030 = vmatpush1.bf16.msra.mxu1 (!%p190_p2), %v4504_v2  ;;  %v4508_v5 = vld [vmem:[%s6827_s1 + $0x334] ss:$24 sps:$4 sm:$0xff] (!%p190_p2)   ;;  %v4510_v6 = vld [vmem:[%s6827_s1 + $0x30] ss:$24 sps:$4 sm:$0xff] (!%p190_p2)   ;;  %v4512_v8 = vld [vmem:[%s6827_s1 + $0x64] ss:$24 sps:$4 sm:$0xff] (!%p190_p2)  }
   0x8   : > { %2073 = vmatpush1.bf16.msra.mxu0 (!%p190_p2), %v4505_v3  ;;  %2031 = vmatprep.subr.bf16.mxu1 (!%p190_p2), %v4506_v4  ;;  %v4511_v7 = vld [vmem:[%s6827_s1 + $0x330] ss:$24 sps:$4 sm:$0xff] (!%p190_p2)   ;;  %v4514_v9 = vld [vmem:[%s6827_s1 + $0x364] ss:$24 sps:$4 sm:$0xff] (!%p190_p2)   ;;  %v4516_v10 = vld [vmem:[%s6827_s1 + $0x60] ss:$24 sps:$4 sm:$0xff] (!%p190_p2)  }
   0x9   : > { %2074 = vmatprep.subr.bf16.mxu0 (!%p190_p2), %v4508_v5  ;;  %v4517_v11 = vld [vmem:[%s6827_s1 + $0x360] ss:$24 sps:$4 sm:$0xff] (!%p190_p2)   ;;  %v4518_v12 = vld [vmem:[%s6827_s1 + $0x94] ss:$24 sps:$4 sm:$0xff] (!%p190_p2)   ;;  %v4522_v14 = vld [vmem:[%s6827_s1 + $0x90] ss:$24 sps:$4 sm:$0xff] (!%p190_p2)  }
   0xa   : > { %v4520_v13 = vld [vmem:[%s6827_s1 + $0x394] ss:$24 sps:$4 sm:$0xff] (!%p190_p2)   ;;  %v4523_v15 = vld [vmem:[%s6827_s1 + $0x390] ss:$24 sps:$4 sm:$0xff] (!%p190_p2)   ;;  %v4524_v16 = vld [vmem:[%s6827_s1 + $0xc4] ss:$24 sps:$4 sm:$0xff] (!%p190_p2)  }
   0xb   : > { %2032 = vmatpush1.bf16.msra.mxu1 (!%p190_p2), %v4510_v6  ;;  %v4526_v17 = vld [vmem:[%s6827_s1 + $0x3c4] ss:$24 sps:$4 sm:$0xff] (!%p190_p2)   ;;  %v4528_v18 = vld [vmem:[%s6827_s1 + $0xc0] ss:$24 sps:$4 sm:$0xff] (!%p190_p2)   ;;  %v4530_v20 = vld [vmem:[%s6827_s1 + $0xf4] ss:$24 sps:$4 sm:$0xff] (!%p190_p2)  }
   0xc   : > { %2075 = vmatpush1.bf16.msra.mxu0 (!%p190_p2), %v4511_v7  ;;  %2033 = vmatprep.subr.bf16.mxu1 (!%p190_p2), %v4512_v8  ;;  %v4529_v19 = vld [vmem:[%s6827_s1 + $0x3c0] ss:$24 sps:$4 sm:$0xff] (!%p190_p2)   ;;  %v4532_v21 = vld [vmem:[%s6827_s1 + $0x3f4] ss:$24 sps:$4 sm:$0xff] (!%p190_p2)   ;;  %v4534_v22 = vld [vmem:[%s6827_s1 + $0xf0] ss:$24 sps:$4 sm:$0xff] (!%p190_p2)  }
   0xd   : > { %2076 = vmatprep.subr.bf16.mxu0 %v4514_v9  ;;  %v4535_v23 = vld [vmem:[%s6827_s1 + $0x3f0] ss:$24 sps:$4 sm:$0xff]   ;;  %v4536_v24 = vld [vmem:[%s6827_s1 + $0x124] ss:$24 sps:$4 sm:$0xff]   ;;  %v4540_v26 = vld [vmem:[%s6827_s1 + $0x120] ss:$24 sps:$4 sm:$0xff]  }
   0xe   : > { %v4538_v25 = vld [vmem:[%s6827_s1 + $0x424] ss:$24 sps:$4 sm:$0xff]   ;;  %v4541_v27 = vld [vmem:[%s6827_s1 + $0x420] ss:$24 sps:$4 sm:$0xff]   ;;  %v4542_v28 = vld [vmem:[%s6827_s1 + $0x154] ss:$24 sps:$4 sm:$0xff]  }
   0xf   : > { %2034 = vmatpush1.bf16.msra.mxu1 %v4516_v10  ;;  %v4544_v29 = vld [vmem:[%s6827_s1 + $0x454] ss:$24 sps:$4 sm:$0xff]   ;;  %v4546_v30 = vld [vmem:[%s6827_s1 + $0x150] ss:$24 sps:$4 sm:$0xff]   ;;  %v4548_v32 = vld [vmem:[%s6827_s1 + $0x184] ss:$24 sps:$4 sm:$0xff]  }
  0x10   : > { %2077 = vmatpush1.bf16.msra.mxu0 %v4517_v11  ;;  %2035 = vmatprep.subr.bf16.mxu1 %v4518_v12  ;;  %v4547_v31 = vld [vmem:[%s6827_s1 + $0x450] ss:$24 sps:$4 sm:$0xff]   ;;  %p220_p3 = scmp.lt.s32.totalorder %s3937_s9, 5  ;;  %v4550_v33 = vld [vmem:[%s6827_s1 + $0x484] ss:$24 sps:$4 sm:$0xff]  }
  0x11   : > { %2078 = vmatprep.subr.bf16.mxu0 %v4520_v13  ;;  %v4552_v34 = vld [vmem:[%s6827_s1 + $0x180] ss:$24 sps:$4 sm:$0xff]   ;;  %v4554_v36 = vld [vmem:[%s6827_s1 + $0x1b4] ss:$24 sps:$4 sm:$0xff]   ;;  %v4558_v38 = vld [vmem:[%s6827_s1 + $0x1b0] ss:$24 sps:$4 sm:$0xff]  }
  0x12   : > { %v4553_v35 = vld [vmem:[%s6827_s1 + $0x480] ss:$24 sps:$4 sm:$0xff]   ;;  %s6833_s9 = smov (!%p220_p3, %s3937_s9), 5  ;;  %v4556_v37 = vld [vmem:[%s6827_s1 + $0x4b4] ss:$24 sps:$4 sm:$0xff]  }
  0x13   : > { %2036 = vmatpush1.bf16.msra.mxu1 %v4522_v14  ;;  %v4559_v39 = vld [vmem:[%s6827_s1 + $0x4b0] ss:$24 sps:$4 sm:$0xff]   ;;  %v4560_v40 = vld [vmem:[%s6827_s1 + $0x1e4] ss:$24 sps:$4 sm:$0xff]   ;;  %s4491_s8 = smul.u32 24, %s6833_s9  ;;  %s4430_s24 = sshll.u32 %s6833_s9, 5 }
  0x14   : > { %2079 = vmatpush1.bf16.msra.mxu0 %v4523_v15  ;;  %2037 = vmatprep.subr.bf16.mxu1 %v4524_v16  ;;  %v4562_v41 = vld [vmem:[%s6827_s1 + $0x4e4] ss:$24 sps:$4 sm:$0xff]   ;;  %v4564_v42 = vld [vmem:[%s6827_s1 + $0x1e0] ss:$24 sps:$4 sm:$0xff]   ;;  %v4566_v44 = vld [vmem:[%s6827_s1 + $0x214] ss:$24 sps:$4 sm:$0xff]   ;;  %s231_s27 = scalar_lea.vmem %s6831_s5, %s4430_s24 }
  0x15   : > { %2080 = vmatprep.subr.bf16.mxu0 %v4526_v17  ;;  %v4565_v43 = vld [vmem:[%s6827_s1 + $0x4e0] ss:$24 sps:$4 sm:$0xff]   ;;  %s5422_s21 = scalar_lea.vmem %s6826_s0, %s4491_s8  ;;  %v4568_v45 = vld [vmem:[%s6827_s1 + $0x514] ss:$24 sps:$4 sm:$0xff]   ;;  %v4570_v46 = vld [vmem:[%s6827_s1 + $0x210] ss:$24 sps:$4 sm:$0xff]  }
  0x16   : > { %v4571_v47 = vld [vmem:[%s6827_s1 + $0x510] ss:$24 sps:$4 sm:$0xff]   ;;  %v4572_v48 = vld [vmem:[%s6827_s1 + $0x244] ss:$24 sps:$4 sm:$0xff]   ;;  %v4576_v52 = vld [vmem:[%s6827_s1 + $0x240] ss:$24 sps:$4 sm:$0xff]  }
  0x17   : > { %2038 = vmatpush1.bf16.msra.mxu1 %v4528_v18  ;;  %v5437_v49 = vld [vmem:[%s5422_s21 + $0x4] ss:$24 sps:$4 sm:$0xff]   ;;  %v4577_v53 = vld [vmem:[%s6827_s1 + $0x540] ss:$24 sps:$4 sm:$0xff]   ;;  %v4578_v54 = vld [vmem:[%s6827_s1 + $0x274] ss:$24 sps:$4 sm:$0xff]  }
  0x18   : > { %2081 = vmatpush1.bf16.msra.mxu0 %v4529_v19  ;;  %2039 = vmatprep.subr.bf16.mxu1 %v4530_v20  ;;  %v5440_v50 = vld [vmem:[%s5422_s21 + $0xc] ss:$24 sps:$4 sm:$0xff]   ;;  %v4582_v56 = vld [vmem:[%s6827_s1 + $0x270] ss:$24 sps:$4 sm:$0xff]   ;;  %v4588_v60 = vld [vmem:[%s6827_s1 + $0x2a0] ss:$24 sps:$4 sm:$0xff]  }
  0x19   : > { %2082 = vmatprep.subr.bf16.mxu0 %v4532_v21  ;;  %v4574_v51 = vld [vmem:[%s6827_s1 + $0x544] ss:$24 sps:$4 sm:$0xff]   ;;  %2061 = vmatprep.mubr.bf16.mxu1 %v5437_v49  ;;  %v4580_v55 = vld [vmem:[%s6827_s1 + $0x574] ss:$24 sps:$4 sm:$0xff]   ;;  %v4583_v57 = vld [vmem:[%s6827_s1 + $0x570] ss:$24 sps:$4 sm:$0xff]  }
  0x1a   : > { %2104 = vmatprep.mubr.bf16.mxu0 %v5440_v50  ;;  %v4584_v58 = vld [vmem:[%s6827_s1 + $0x2a4] ss:$24 sps:$4 sm:$0xff]   ;;  %v4589_v61 = vld [vmem:[%s6827_s1 + $0x5a0] ss:$24 sps:$4 sm:$0xff]   ;;  %v4590_v62 = vld [vmem:[%s6827_s1 + $0x2d4] ss:$24 sps:$4 sm:$0xff]  }
  0x1b   : > { %2040 = vmatpush1.bf16.msra.mxu1 %v4534_v22  ;;  %v4586_v59 = vld [vmem:[%s6827_s1 + $0x5a4] ss:$24 sps:$4 sm:$0xff]   ;;  %v4592_v63 = vld [vmem:[%s6827_s1 + $0x5d4] ss:$24 sps:$4 sm:$0xff]   ;;  %v4594_v0 = vld [vmem:[%s6827_s1 + $0x2d0] ss:$24 sps:$4 sm:$0xff]  }
  0x1c   : > { %2083 = vmatpush1.bf16.msra.mxu0 %v4535_v23  ;;  %2041 = vmatprep.subr.bf16.mxu1 %v4536_v24  ;;  %v4595_v1 = vld [vmem:[%s6827_s1 + $0x5d0] ss:$24 sps:$4 sm:$0xff]   ;;  %v4603_v2 = vld [vmem:[%s6827_s1 + $0x604] ss:$24 sps:$4 sm:$0xff]   ;;  %v5496_v4 = vld [vmem:[%s5422_s21] ss:$24 sps:$4 sm:$0xff]  }
  0x1d   : > { %2084 = vmatprep.subr.bf16.mxu0 %v4538_v25  ;;  %v4606_v3 = vld [vmem:[%s6827_s1 + $0xc] ss:$24 sps:$4 sm:$0xff]   ;;  %v4601_v5 = vld [vmem:[%s6827_s1 + $0x600] ss:$24 sps:$4 sm:$0xff]   ;;  %v4613_v9 = vld [vmem:[%s6827_s1 + $0x3c] ss:$24 sps:$4 sm:$0xff]  }
  0x1e   : > { %v4604_v6 = vld [vmem:[%s6827_s1 + $0x8] ss:$24 sps:$4 sm:$0xff]   ;;  %v4610_v8 = vld [vmem:[%s6827_s1 + $0x634] ss:$24 sps:$4 sm:$0xff]   ;;  %v4611_v11 = vld [vmem:[%s6827_s1 + $0x38] ss:$24 sps:$4 sm:$0xff]  }
  0x1f   : > { %2042 = vmatpush1.bf16.msra.mxu1 %v4540_v26  ;;  %v5505_v7 = vld [vmem:[%s5422_s21 + $0x8] ss:$24 sps:$4 sm:$0xff]   ;;  %v4616_v12 = vld [vmem:[%s6827_s1 + $0x664] ss:$24 sps:$4 sm:$0xff]   ;;  %v4622_v16 = vld [vmem:[%s6827_s1 + $0x694] ss:$24 sps:$4 sm:$0xff]  }
  0x20   : > { %2085 = vmatpush1.bf16.msra.mxu0 %v4541_v27  ;;  %2043 = vmatprep.subr.bf16.mxu1 %v4542_v28  ;;  %v4608_v10 = vld [vmem:[%s6827_s1 + $0x630] ss:$24 sps:$4 sm:$0xff]   ;;  %v4619_v13 = vld [vmem:[%s6827_s1 + $0x6c] ss:$24 sps:$4 sm:$0xff]   ;;  %v4614_v14 = vld [vmem:[%s6827_s1 + $0x660] ss:$24 sps:$4 sm:$0xff]  }
  0x21   : > { %2086 = vmatprep.subr.bf16.mxu0 %v4544_v29  ;;  %v4617_v15 = vld [vmem:[%s6827_s1 + $0x68] ss:$24 sps:$4 sm:$0xff]   ;;  %v4625_v17 = vld [vmem:[%s6827_s1 + $0x9c] ss:$24 sps:$4 sm:$0xff]   ;;  %v4623_v19 = vld [vmem:[%s6827_s1 + $0x98] ss:$24 sps:$4 sm:$0xff]  }
  0x22   : > { %v4620_v18 = vld [vmem:[%s6827_s1 + $0x690] ss:$24 sps:$4 sm:$0xff]   ;;  %v4628_v20 = vld [vmem:[%s6827_s1 + $0x6c4] ss:$24 sps:$4 sm:$0xff]   ;;  %v4626_v22 = vld [vmem:[%s6827_s1 + $0x6c0] ss:$24 sps:$4 sm:$0xff]  }
  0x23   : > { %2044 = vmatpush1.bf16.msra.mxu1 %v4546_v30  ;;  %v4631_v21 = vld [vmem:[%s6827_s1 + $0xcc] ss:$24 sps:$4 sm:$0xff]   ;;  %v4629_v23 = vld [vmem:[%s6827_s1 + $0xc8] ss:$24 sps:$4 sm:$0xff]   ;;  %v4637_v25 = vld [vmem:[%s6827_s1 + $0xfc] ss:$24 sps:$4 sm:$0xff]  }
  0x24   : > { %2087 = vmatpush1.bf16.msra.mxu0 %v4547_v31  ;;  %2045 = vmatprep.subr.bf16.mxu1 %v4548_v32  ;;  %v4634_v24 = vld [vmem:[%s6827_s1 + $0x6f4] ss:$24 sps:$4 sm:$0xff]   ;;  %v4632_v26 = vld [vmem:[%s6827_s1 + $0x6f0] ss:$24 sps:$4 sm:$0xff]   ;;  %v4640_v28 = vld [vmem:[%s6827_s1 + $0x724] ss:$24 sps:$4 sm:$0xff]  }
  0x25   : > { %2088 = vmatprep.subr.bf16.mxu0 %v4550_v33  ;;  %v4635_v27 = vld [vmem:[%s6827_s1 + $0xf8] ss:$24 sps:$4 sm:$0xff]   ;;  %v4643_v29 = vld [vmem:[%s6827_s1 + $0x12c] ss:$24 sps:$4 sm:$0xff]   ;;  %v4641_v31 = vld [vmem:[%s6827_s1 + $0x128] ss:$24 sps:$4 sm:$0xff]  }
  0x26   : > { %v4638_v30 = vld [vmem:[%s6827_s1 + $0x720] ss:$24 sps:$4 sm:$0xff]   ;;  %v4646_v32 = vld [vmem:[%s6827_s1 + $0x754] ss:$24 sps:$4 sm:$0xff]  }
  0x27   : > { %2046 = vmatpush1.bf16.msra.mxu1 %v4552_v34  ;;  %v4649_v33 = vld [vmem:[%s6827_s1 + $0x15c] ss:$24 sps:$4 sm:$0xff]  }
  0x28   : > { %2089 = vmatpush1.bf16.msra.mxu0 %v4553_v35  ;;  %2047 = vmatprep.subr.bf16.mxu1 %v4554_v36  ;;  %v5589_v34 = vld [vmem:[%s5422_s21 + $0x14] ss:$24 sps:$4 sm:$0xff]   ;;  %v4644_v35 = vld [vmem:[%s6827_s1 + $0x750] ss:$24 sps:$4 sm:$0xff]  }
  0x29   : > { %2090 = vmatprep.subr.bf16.mxu0 %v4556_v37  ;;  %v4647_v36 = vld [vmem:[%s6827_s1 + $0x158] ss:$24 sps:$4 sm:$0xff]   ;;  %v4652_v37 = vld [vmem:[%s6827_s1 + $0x784] ss:$24 sps:$4 sm:$0xff]  }
  0x2b   : > { %2048 = vmatpush1.bf16.msra.mxu1 %v4558_v38  ;;  %v4655_v38 = vld [vmem:[%s6827_s1 + $0x18c] ss:$24 sps:$4 sm:$0xff]  }
  0x2c   : > { %2091 = vmatpush1.bf16.msra.mxu0 %v4559_v39  ;;  %2049 = vmatprep.subr.bf16.mxu1 %v4560_v40  ;;  %v4650_v39 = vld [vmem:[%s6827_s1 + $0x780] ss:$24 sps:$4 sm:$0xff]  }
  0x2d   : > { %2092 = vmatprep.subr.bf16.mxu0 %v4562_v41  ;;  %v4653_v40 = vld [vmem:[%s6827_s1 + $0x188] ss:$24 sps:$4 sm:$0xff]   ;;  %v4658_v41 = vld [vmem:[%s6827_s1 + $0x7b4] ss:$24 sps:$4 sm:$0xff]  }
  0x2f   : > { %2050 = vmatpush1.bf16.msra.mxu1 %v4564_v42  ;;  %v4661_v42 = vld [vmem:[%s6827_s1 + $0x1bc] ss:$24 sps:$4 sm:$0xff]  }
  0x30   : > { %2093 = vmatpush1.bf16.msra.mxu0 %v4565_v43  ;;  %2051 = vmatprep.subr.bf16.mxu1 %v4566_v44  ;;  %v4656_v43 = vld [vmem:[%s6827_s1 + $0x7b0] ss:$24 sps:$4 sm:$0xff]  }
  0x31   : > { %2094 = vmatprep.subr.bf16.mxu0 %v4568_v45  ;;  %v4659_v44 = vld [vmem:[%s6827_s1 + $0x1b8] ss:$24 sps:$4 sm:$0xff]   ;;  %v4664_v45 = vld [vmem:[%s6827_s1 + $0x7e4] ss:$24 sps:$4 sm:$0xff]  }
  0x33   : > { %2052 = vmatpush1.bf16.msra.mxu1 %v4570_v46  ;;  %v4667_v46 = vld [vmem:[%s6827_s1 + $0x1ec] ss:$24 sps:$4 sm:$0xff]  }
  0x34   : > { %2095 = vmatpush1.bf16.msra.mxu0 %v4571_v47  ;;  %2053 = vmatprep.subr.bf16.mxu1 %v4572_v48  ;;  %v4662_v47 = vld [vmem:[%s6827_s1 + $0x7e0] ss:$24 sps:$4 sm:$0xff]  }
  0x35   : > { %2096 = vmatprep.subr.bf16.mxu0 %v4574_v51  ;;  %v4665_v48 = vld [vmem:[%s6827_s1 + $0x1e8] ss:$24 sps:$4 sm:$0xff]   ;;  %v4670_v51 = vld [vmem:[%s6827_s1 + $0x814] ss:$24 sps:$4 sm:$0xff]  }
  0x37   : > { %2054 = vmatpush1.bf16.msra.mxu1 %v4576_v52  ;;  %v4673_v52 = vld [vmem:[%s6827_s1 + $0x21c] ss:$24 sps:$4 sm:$0xff]  }
  0x38   : > { %2097 = vmatpush1.bf16.msra.mxu0 %v4577_v53  ;;  %2055 = vmatprep.subr.bf16.mxu1 %v4578_v54  ;;  %v4668_v53 = vld [vmem:[%s6827_s1 + $0x810] ss:$24 sps:$4 sm:$0xff]  }
  0x39   : > { %2098 = vmatprep.subr.bf16.mxu0 %v4580_v55  ;;  %v4671_v54 = vld [vmem:[%s6827_s1 + $0x218] ss:$24 sps:$4 sm:$0xff]   ;;  %v4676_v55 = vld [vmem:[%s6827_s1 + $0x844] ss:$24 sps:$4 sm:$0xff]  }
  0x3b   : > { %2056 = vmatpush1.bf16.msra.mxu1 %v4582_v56  ;;  %v4679_v56 = vld [vmem:[%s6827_s1 + $0x24c] ss:$24 sps:$4 sm:$0xff]  }
  0x3c   : > { %2099 = vmatpush1.bf16.msra.mxu0 %v4583_v57  ;;  %2057 = vmatprep.subr.bf16.mxu1 %v4584_v58  ;;  %v4674_v57 = vld [vmem:[%s6827_s1 + $0x840] ss:$24 sps:$4 sm:$0xff]  }
  0x3d   : > { %2100 = vmatprep.subr.bf16.mxu0 %v4586_v59  ;;  %v4677_v58 = vld [vmem:[%s6827_s1 + $0x248] ss:$24 sps:$4 sm:$0xff]   ;;  %v4682_v59 = vld [vmem:[%s6827_s1 + $0x874] ss:$24 sps:$4 sm:$0xff]  }
  0x3f   : > { %2058 = vmatpush1.bf16.msra.mxu1 %v4588_v60  ;;  %v4685_v60 = vld [vmem:[%s6827_s1 + $0x27c] ss:$24 sps:$4 sm:$0xff]  }
  0x40   : > { %2101 = vmatpush1.bf16.msra.mxu0 %v4589_v61  ;;  %2059 = vmatprep.subr.bf16.mxu1 %v4590_v62  ;;  %v4680_v61 = vld [vmem:[%s6827_s1 + $0x870] ss:$24 sps:$4 sm:$0xff]  }
  0x41   : > { %2102 = vmatprep.subr.bf16.mxu0 %v4592_v63  ;;  %v4683_v62 = vld [vmem:[%s6827_s1 + $0x278] ss:$24 sps:$4 sm:$0xff]   ;;  %v4688_v63 = vld [vmem:[%s6827_s1 + $0x8a4] ss:$24 sps:$4 sm:$0xff]  }
  0x43   : > { %2060 = vmatpush1.bf16.msra.mxu1 %v4594_v0  ;;  %v4691_v0 = vld [vmem:[%s6827_s1 + $0x2ac] ss:$24 sps:$4 sm:$0xff]  }
  0x44   : > { %2103 = vmatpush1.bf16.msra.mxu0 %v4595_v1  ;;  %2158 = vmatprep.subr.bf16.mxu1 %v4606_v3  ;;  %v4686_v1 = vld [vmem:[%s6827_s1 + $0x8a0] ss:$24 sps:$4 sm:$0xff]   ;;  %v4694_v3 = vld [vmem:[%s6827_s1 + $0x8d4] ss:$24 sps:$4 sm:$0xff]  }
  0x45   : > { %2115 = vmatprep.subr.bf16.mxu0 %v4603_v2  ;;  %v4689_v2 = vld [vmem:[%s6827_s1 + $0x2a8] ss:$24 sps:$4 sm:$0xff]  }
  0x46   : > { %2062 = vmatmul.mubr.bf16.vlgmr.msra.gmra.mrb[0].mxu1 %v5496_v4 }
  0x47   : > { %2105 = vmatmul.mubr.bf16.vlgmr.msra.gmra.mrb[0].mxu0 %v5505_v7  ;;  %2159 = vmatpush1.bf16.msra.mxu1 %v4604_v6  ;;  %v4692_v6 = vld [vmem:[%s6827_s1 + $0x8d0] ss:$24 sps:$4 sm:$0xff]  }
  0x48   : > { %2116 = vmatpush1.bf16.msra.mxu0 %v4601_v5  ;;  %2160 = vmatprep.subr.bf16.mxu1 %v4613_v9  ;;  %v4697_v5 = vld [vmem:[%s6827_s1 + $0x2dc] ss:$24 sps:$4 sm:$0xff]   ;;  %v4703_v9 = vld [vmem:[%s6827_s1 + $0x30c] ss:$24 sps:$4 sm:$0xff]  }
  0x49   : > { %2117 = vmatprep.subr.bf16.mxu0 %v4610_v8  ;;  %2190 = vmatprep.mubr.bf16.mxu1 %v5437_v49  ;;  %v4695_v8 = vld [vmem:[%s6827_s1 + $0x2d8] ss:$24 sps:$4 sm:$0xff]  }
  0x4a   : > { %2147 = vmatprep.mubr.bf16.mxu0 %v5589_v34 }
  0x4b   : > { %2161 = vmatpush1.bf16.msra.mxu1 %v4611_v11  ;;  %v5701_v11 = vld [vmem:[%s5422_s21 + $0x10] ss:$24 sps:$4 sm:$0xff]  }
  0x4c   : > { %2118 = vmatpush1.bf16.msra.mxu0 %v4608_v10  ;;  %2162 = vmatprep.subr.bf16.mxu1 %v4619_v13  ;;  %v4706_v10 = vld [vmem:[%s6827_s1 + $0x14] ss:$24 sps:$4 sm:$0xff]   ;;  %v4704_v13 = vld [vmem:[%s6827_s1 + $0x10] ss:$24 sps:$4 sm:$0xff]  }
  0x4d   : > { %2119 = vmatprep.subr.bf16.mxu0 %v4616_v12  ;;  %v4701_v12 = vld [vmem:[%s6827_s1 + $0x308] ss:$24 sps:$4 sm:$0xff]  }
  0x4f   : > { %2163 = vmatpush1.bf16.msra.mxu1 %v4617_v15  ;;  %v4712_v15 = vld [vmem:[%s6827_s1 + $0x44] ss:$24 sps:$4 sm:$0xff]  }
  0x50   : > { %2120 = vmatpush1.bf16.msra.mxu0 %v4614_v14  ;;  %2164 = vmatprep.subr.bf16.mxu1 %v4625_v17  ;;  %v4709_v14 = vld [vmem:[%s6827_s1 + $0x33c] ss:$24 sps:$4 sm:$0xff]   ;;  %v4710_v17 = vld [vmem:[%s6827_s1 + $0x40] ss:$24 sps:$4 sm:$0xff]  }
  0x51   : > { %2121 = vmatprep.subr.bf16.mxu0 %v4622_v16  ;;  %v4707_v16 = vld [vmem:[%s6827_s1 + $0x338] ss:$24 sps:$4 sm:$0xff]  }
  0x53   : > { %2165 = vmatpush1.bf16.msra.mxu1 %v4623_v19  ;;  %v4718_v19 = vld [vmem:[%s6827_s1 + $0x74] ss:$24 sps:$4 sm:$0xff]  }
  0x54   : > { %2122 = vmatpush1.bf16.msra.mxu0 %v4620_v18  ;;  %2166 = vmatprep.subr.bf16.mxu1 %v4631_v21  ;;  %v4715_v18 = vld [vmem:[%s6827_s1 + $0x36c] ss:$24 sps:$4 sm:$0xff]   ;;  %v4716_v21 = vld [vmem:[%s6827_s1 + $0x70] ss:$24 sps:$4 sm:$0xff]  }
  0x55   : > { %2123 = vmatprep.subr.bf16.mxu0 %v4628_v20  ;;  %v4713_v20 = vld [vmem:[%s6827_s1 + $0x368] ss:$24 sps:$4 sm:$0xff]  }
  0x57   : > { %2167 = vmatpush1.bf16.msra.mxu1 %v4629_v23  ;;  %v4722_v23 = vld [vmem:[%s6827_s1 + $0xa0] ss:$24 sps:$4 sm:$0xff]  }
  0x58   : > { %2124 = vmatpush1.bf16.msra.mxu0 %v4626_v22  ;;  %2168 = vmatprep.subr.bf16.mxu1 %v4637_v25  ;;  %v4721_v22 = vld [vmem:[%s6827_s1 + $0x39c] ss:$24 sps:$4 sm:$0xff]  }
  0x59   : > { %2125 = vmatprep.subr.bf16.mxu0 %v4634_v24  ;;  %v4727_v24 = vld [vmem:[%s6827_s1 + $0x3cc] ss:$24 sps:$4 sm:$0xff]  }
  0x5a   : > { %v4730_v25 = vld [vmem:[%s6827_s1 + $0xd4] ss:$24 sps:$4 sm:$0xff]  }
  0x5b   : > { %2169 = vmatpush1.bf16.msra.mxu1 %v4635_v27  ;;  %v4728_v27 = vld [vmem:[%s6827_s1 + $0xd0] ss:$24 sps:$4 sm:$0xff]  }
  0x5c   : > { %2126 = vmatpush1.bf16.msra.mxu0 %v4632_v26  ;;  %2170 = vmatprep.subr.bf16.mxu1 %v4643_v29  ;;  %v4725_v26 = vld [vmem:[%s6827_s1 + $0x3c8] ss:$24 sps:$4 sm:$0xff]   ;;  %v4736_v29 = vld [vmem:[%s6827_s1 + $0x104] ss:$24 sps:$4 sm:$0xff]  }
  0x5d   : > { %2127 = vmatprep.subr.bf16.mxu0 %v4640_v28  ;;  %v4733_v28 = vld [vmem:[%s6827_s1 + $0x3fc] ss:$24 sps:$4 sm:$0xff]  }
  0x5f   : > { %2171 = vmatpush1.bf16.msra.mxu1 %v4641_v31  ;;  %v4734_v31 = vld [vmem:[%s6827_s1 + $0x100] ss:$24 sps:$4 sm:$0xff]  }
  0x60   : > { %2128 = vmatpush1.bf16.msra.mxu0 %v4638_v30  ;;  %2172 = vmatprep.subr.bf16.mxu1 %v4649_v33  ;;  %v4731_v30 = vld [vmem:[%s6827_s1 + $0x3f8] ss:$24 sps:$4 sm:$0xff]   ;;  %v4742_v33 = vld [vmem:[%s6827_s1 + $0x134] ss:$24 sps:$4 sm:$0xff]  }
  0x61   : > { %2129 = vmatprep.subr.bf16.mxu0 %v4646_v32  ;;  %v4739_v32 = vld [vmem:[%s6827_s1 + $0x42c] ss:$24 sps:$4 sm:$0xff]  }
  0x63   : > { %2173 = vmatpush1.bf16.msra.mxu1 %v4647_v36  ;;  %v4740_v36 = vld [vmem:[%s6827_s1 + $0x130] ss:$24 sps:$4 sm:$0xff]  }
  0x64   : > { %2130 = vmatpush1.bf16.msra.mxu0 %v4644_v35  ;;  %2174 = vmatprep.subr.bf16.mxu1 %v4655_v38  ;;  %v4737_v35 = vld [vmem:[%s6827_s1 + $0x428] ss:$24 sps:$4 sm:$0xff]   ;;  %v4748_v38 = vld [vmem:[%s6827_s1 + $0x164] ss:$24 sps:$4 sm:$0xff]  }
  0x65   : > { %2131 = vmatprep.subr.bf16.mxu0 %v4652_v37  ;;  %v4745_v37 = vld [vmem:[%s6827_s1 + $0x45c] ss:$24 sps:$4 sm:$0xff]  }
  0x67   : > { %2175 = vmatpush1.bf16.msra.mxu1 %v4653_v40  ;;  %v4746_v40 = vld [vmem:[%s6827_s1 + $0x160] ss:$24 sps:$4 sm:$0xff]  }
  0x68   : > { %2132 = vmatpush1.bf16.msra.mxu0 %v4650_v39  ;;  %2176 = vmatprep.subr.bf16.mxu1 %v4661_v42  ;;  %v4743_v39 = vld [vmem:[%s6827_s1 + $0x458] ss:$24 sps:$4 sm:$0xff]   ;;  %v4754_v42 = vld [vmem:[%s6827_s1 + $0x194] ss:$24 sps:$4 sm:$0xff]  }
  0x69   : > { %2133 = vmatprep.subr.bf16.mxu0 %v4658_v41  ;;  %v4751_v41 = vld [vmem:[%s6827_s1 + $0x48c] ss:$24 sps:$4 sm:$0xff]  }
  0x6b   : > { %2177 = vmatpush1.bf16.msra.mxu1 %v4659_v44  ;;  %v4752_v44 = vld [vmem:[%s6827_s1 + $0x190] ss:$24 sps:$4 sm:$0xff]  }
  0x6c   : > { %2134 = vmatpush1.bf16.msra.mxu0 %v4656_v43  ;;  %2178 = vmatprep.subr.bf16.mxu1 %v4667_v46  ;;  %v4749_v43 = vld [vmem:[%s6827_s1 + $0x488] ss:$24 sps:$4 sm:$0xff]   ;;  %v4760_v46 = vld [vmem:[%s6827_s1 + $0x1c4] ss:$24 sps:$4 sm:$0xff]  }
  0x6d   : > { %2135 = vmatprep.subr.bf16.mxu0 %v4664_v45  ;;  %v4757_v45 = vld [vmem:[%s6827_s1 + $0x4bc] ss:$24 sps:$4 sm:$0xff]  }
  0x6f   : > { %2179 = vmatpush1.bf16.msra.mxu1 %v4665_v48  ;;  %v4758_v48 = vld [vmem:[%s6827_s1 + $0x1c0] ss:$24 sps:$4 sm:$0xff]  }
  0x70   : > { %2136 = vmatpush1.bf16.msra.mxu0 %v4662_v47  ;;  %2180 = vmatprep.subr.bf16.mxu1 %v4673_v52  ;;  %v4755_v47 = vld [vmem:[%s6827_s1 + $0x4b8] ss:$24 sps:$4 sm:$0xff]   ;;  %v4766_v52 = vld [vmem:[%s6827_s1 + $0x1f4] ss:$24 sps:$4 sm:$0xff]  }
  0x71   : > { %2137 = vmatprep.subr.bf16.mxu0 %v4670_v51  ;;  %v4763_v51 = vld [vmem:[%s6827_s1 + $0x4ec] ss:$24 sps:$4 sm:$0xff]  }
  0x73   : > { %2181 = vmatpush1.bf16.msra.mxu1 %v4671_v54  ;;  %v4764_v54 = vld [vmem:[%s6827_s1 + $0x1f0] ss:$24 sps:$4 sm:$0xff]  }
  0x74   : > { %2138 = vmatpush1.bf16.msra.mxu0 %v4668_v53  ;;  %2182 = vmatprep.subr.bf16.mxu1 %v4679_v56  ;;  %v4761_v53 = vld [vmem:[%s6827_s1 + $0x4e8] ss:$24 sps:$4 sm:$0xff]   ;;  %v4772_v56 = vld [vmem:[%s6827_s1 + $0x224] ss:$24 sps:$4 sm:$0xff]  }
  0x75   : > { %2139 = vmatprep.subr.bf16.mxu0 %v4676_v55  ;;  %v4769_v55 = vld [vmem:[%s6827_s1 + $0x51c] ss:$24 sps:$4 sm:$0xff]  }
  0x77   : > { %2183 = vmatpush1.bf16.msra.mxu1 %v4677_v58  ;;  %v4770_v58 = vld [vmem:[%s6827_s1 + $0x220] ss:$24 sps:$4 sm:$0xff]  }
  0x78   : > { %2140 = vmatpush1.bf16.msra.mxu0 %v4674_v57  ;;  %2184 = vmatprep.subr.bf16.mxu1 %v4685_v60  ;;  %v4767_v57 = vld [vmem:[%s6827_s1 + $0x518] ss:$24 sps:$4 sm:$0xff]   ;;  %v4778_v60 = vld [vmem:[%s6827_s1 + $0x254] ss:$24 sps:$4 sm:$0xff]  }
  0x79   : > { %2141 = vmatprep.subr.bf16.mxu0 %v4682_v59  ;;  %v4775_v59 = vld [vmem:[%s6827_s1 + $0x54c] ss:$24 sps:$4 sm:$0xff]  }
  0x7b   : > { %2185 = vmatpush1.bf16.msra.mxu1 %v4683_v62  ;;  %v4776_v62 = vld [vmem:[%s6827_s1 + $0x250] ss:$24 sps:$4 sm:$0xff]  }
  0x7c   : > { %2142 = vmatpush1.bf16.msra.mxu0 %v4680_v61  ;;  %2186 = vmatprep.subr.bf16.mxu1 %v4691_v0  ;;  %v4773_v61 = vld [vmem:[%s6827_s1 + $0x548] ss:$24 sps:$4 sm:$0xff]   ;;  %v4784_v0 = vld [vmem:[%s6827_s1 + $0x284] ss:$24 sps:$4 sm:$0xff]  }
  0x7d   : > { %2143 = vmatprep.subr.bf16.mxu0 %v4688_v63  ;;  %v4781_v63 = vld [vmem:[%s6827_s1 + $0x57c] ss:$24 sps:$4 sm:$0xff]  }
  0x7f   : > { %2187 = vmatpush1.bf16.msra.mxu1 %v4689_v2  ;;  %v4782_v2 = vld [vmem:[%s6827_s1 + $0x280] ss:$24 sps:$4 sm:$0xff]  }
  0x80   : > { %2144 = vmatpush1.bf16.msra.mxu0 %v4686_v1  ;;  %2188 = vmatprep.subr.bf16.mxu1 %v4697_v5  ;;  %v4779_v1 = vld [vmem:[%s6827_s1 + $0x578] ss:$24 sps:$4 sm:$0xff]   ;;  %v4790_v5 = vld [vmem:[%s6827_s1 + $0x2b4] ss:$24 sps:$4 sm:$0xff]  }
  0x81   : > { %2145 = vmatprep.subr.bf16.mxu0 %v4694_v3  ;;  %v4787_v3 = vld [vmem:[%s6827_s1 + $0x5ac] ss:$24 sps:$4 sm:$0xff]  }
  0x83   : > { %2189 = vmatpush1.bf16.msra.mxu1 %v4695_v8  ;;  %v4788_v8 = vld [vmem:[%s6827_s1 + $0x2b0] ss:$24 sps:$4 sm:$0xff]  }
  0x84   : > { %2146 = vmatpush1.bf16.msra.mxu0 %v4692_v6  ;;  %2201 = vmatprep.subr.bf16.mxu1 %v4703_v9  ;;  %v4785_v6 = vld [vmem:[%s6827_s1 + $0x5a8] ss:$24 sps:$4 sm:$0xff]   ;;  %v4793_v9 = vld [vmem:[%s6827_s1 + $0x5dc] ss:$24 sps:$4 sm:$0xff]  }
  0x85   : > { %2287 = vmatprep.subr.bf16.mxu0 %v4706_v10  ;;  %v4796_v10 = vld [vmem:[%s6827_s1 + $0x2e4] ss:$24 sps:$4 sm:$0xff]  }
  0x86   : > { %2191 = vmatmul.mubr.bf16.vlgmr.msra.gmra.mrb[4].mxu1 %v5496_v4 }
  0x87   : > { %2148 = vmatmul.mubr.bf16.vlgmr.msra.gmra.mrb[0].mxu0 %v5701_v11  ;;  %2202 = vmatpush1.bf16.msra.mxu1 %v4701_v12  ;;  %v4791_v12 = vld [vmem:[%s6827_s1 + $0x5d8] ss:$24 sps:$4 sm:$0xff]  }
  0x88   : > { %2288 = vmatpush1.bf16.msra.mxu0 %v4704_v13  ;;  %2203 = vmatprep.subr.bf16.mxu1 %v4709_v14  ;;  %v4794_v13 = vld [vmem:[%s6827_s1 + $0x2e0] ss:$24 sps:$4 sm:$0xff]   ;;  %v4799_v14 = vld [vmem:[%s6827_s1 + $0x60c] ss:$24 sps:$4 sm:$0xff]  }
  0x89   : > { %2289 = vmatprep.subr.bf16.mxu0 %v4712_v15  ;;  %2233 = vmatprep.mubr.bf16.mxu1 %v5440_v50  ;;  %v4719_v50 = vld [vmem:[%s6827_s1 + $0x398] ss:$24 sps:$4 sm:$0xff]   ;;  %v4802_v15 = vld [vmem:[%s6827_s1 + $0x314] ss:$24 sps:$4 sm:$0xff]  }
  0x8a   : > { %2319 = vmatprep.mubr.bf16.mxu0 %v5437_v49  ;;  %v4724_v49 = vld [vmem:[%s6827_s1 + $0xa4] ss:$24 sps:$4 sm:$0xff]  }
  0x8b   : > { %2204 = vmatpush1.bf16.msra.mxu1 %v4707_v16  ;;  %v4797_v16 = vld [vmem:[%s6827_s1 + $0x608] ss:$24 sps:$4 sm:$0xff]  }
  0x8c   : > { %2290 = vmatpush1.bf16.msra.mxu0 %v4710_v17  ;;  %2205 = vmatprep.subr.bf16.mxu1 %v4715_v18  ;;  %v4800_v17 = vld [vmem:[%s6827_s1 + $0x310] ss:$24 sps:$4 sm:$0xff]   ;;  %v4805_v18 = vld [vmem:[%s6827_s1 + $0x63c] ss:$24 sps:$4 sm:$0xff]  }
  0x8d   : > { %2291 = vmatprep.subr.bf16.mxu0 %v4718_v19  ;;  %v4808_v19 = vld [vmem:[%s6827_s1 + $0x344] ss:$24 sps:$4 sm:$0xff]  }
  0x8f   : > { %2206 = vmatpush1.bf16.msra.mxu1 %v4713_v20  ;;  %v4803_v20 = vld [vmem:[%s6827_s1 + $0x638] ss:$24 sps:$4 sm:$0xff]  }
  0x90   : > { %2292 = vmatpush1.bf16.msra.mxu0 %v4716_v21  ;;  %2207 = vmatprep.subr.bf16.mxu1 %v4721_v22  ;;  %v4806_v21 = vld [vmem:[%s6827_s1 + $0x340] ss:$24 sps:$4 sm:$0xff]   ;;  %v4811_v22 = vld [vmem:[%s6827_s1 + $0x66c] ss:$24 sps:$4 sm:$0xff]  }
  0x91   : > { %2293 = vmatprep.subr.bf16.mxu0 %v4724_v49  ;;  %v4809_v49 = vld [vmem:[%s6827_s1 + $0x668] ss:$24 sps:$4 sm:$0xff]  }
  0x93   : > { %2208 = vmatpush1.bf16.msra.mxu1 %v4719_v50  ;;  %v4812_v50 = vld [vmem:[%s6827_s1 + $0x370] ss:$24 sps:$4 sm:$0xff]  }
  0x94   : > { %2294 = vmatpush1.bf16.msra.mxu0 %v4722_v23  ;;  %2209 = vmatprep.subr.bf16.mxu1 %v4727_v24  ;;  %v4817_v23 = vld [vmem:[%s6827_s1 + $0x69c] ss:$24 sps:$4 sm:$0xff]   ;;  %v4815_v24 = vld [vmem:[%s6827_s1 + $0x698] ss:$24 sps:$4 sm:$0xff]  }
  0x95   : > { %2295 = vmatprep.subr.bf16.mxu0 %v4730_v25  ;;  %v4818_v25 = vld [vmem:[%s6827_s1 + $0x3a0] ss:$24 sps:$4 sm:$0xff]  }
  0x97   : > { %2210 = vmatpush1.bf16.msra.mxu1 %v4725_v26  ;;  %v4823_v26 = vld [vmem:[%s6827_s1 + $0x6cc] ss:$24 sps:$4 sm:$0xff]  }
  0x98   : > { %2296 = vmatpush1.bf16.msra.mxu0 %v4728_v27  ;;  %2211 = vmatprep.subr.bf16.mxu1 %v4733_v28  ;;  %v4826_v27 = vld [vmem:[%s6827_s1 + $0x3d4] ss:$24 sps:$4 sm:$0xff]   ;;  %v4821_v28 = vld [vmem:[%s6827_s1 + $0x6c8] ss:$24 sps:$4 sm:$0xff]  }
  0x99   : > { %2297 = vmatprep.subr.bf16.mxu0 %v4736_v29  ;;  %v4824_v29 = vld [vmem:[%s6827_s1 + $0x3d0] ss:$24 sps:$4 sm:$0xff]  }
  0x9b   : > { %2212 = vmatpush1.bf16.msra.mxu1 %v4731_v30  ;;  %v4829_v30 = vld [vmem:[%s6827_s1 + $0x6fc] ss:$24 sps:$4 sm:$0xff]  }
  0x9c   : > { %2298 = vmatpush1.bf16.msra.mxu0 %v4734_v31  ;;  %2213 = vmatprep.subr.bf16.mxu1 %v4739_v32  ;;  %v4832_v31 = vld [vmem:[%s6827_s1 + $0x404] ss:$24 sps:$4 sm:$0xff]   ;;  %v4827_v32 = vld [vmem:[%s6827_s1 + $0x6f8] ss:$24 sps:$4 sm:$0xff]  }
  0x9d   : > { %2299 = vmatprep.subr.bf16.mxu0 %v4742_v33  ;;  %v4830_v33 = vld [vmem:[%s6827_s1 + $0x400] ss:$24 sps:$4 sm:$0xff]  }
  0x9f   : > { %2214 = vmatpush1.bf16.msra.mxu1 %v4737_v35  ;;  %v4835_v35 = vld [vmem:[%s6827_s1 + $0x72c] ss:$24 sps:$4 sm:$0xff]  }
  0xa0   : > { %2300 = vmatpush1.bf16.msra.mxu0 %v4740_v36  ;;  %2215 = vmatprep.subr.bf16.mxu1 %v4745_v37  ;;  %v4838_v36 = vld [vmem:[%s6827_s1 + $0x434] ss:$24 sps:$4 sm:$0xff]   ;;  %v4833_v37 = vld [vmem:[%s6827_s1 + $0x728] ss:$24 sps:$4 sm:$0xff]  }
  0xa1   : > { %2301 = vmatprep.subr.bf16.mxu0 %v4748_v38  ;;  %v4836_v38 = vld [vmem:[%s6827_s1 + $0x430] ss:$24 sps:$4 sm:$0xff]  }
  0xa3   : > { %2216 = vmatpush1.bf16.msra.mxu1 %v4743_v39  ;;  %v4841_v39 = vld [vmem:[%s6827_s1 + $0x75c] ss:$24 sps:$4 sm:$0xff]  }
  0xa4   : > { %2302 = vmatpush1.bf16.msra.mxu0 %v4746_v40  ;;  %2217 = vmatprep.subr.bf16.mxu1 %v4751_v41  ;;  %v4844_v40 = vld [vmem:[%s6827_s1 + $0x464] ss:$24 sps:$4 sm:$0xff]   ;;  %v4839_v41 = vld [vmem:[%s6827_s1 + $0x758] ss:$24 sps:$4 sm:$0xff]  }
  0xa5   : > { %2303 = vmatprep.subr.bf16.mxu0 %v4754_v42  ;;  %v4842_v42 = vld [vmem:[%s6827_s1 + $0x460] ss:$24 sps:$4 sm:$0xff]  }
  0xa7   : > { %2218 = vmatpush1.bf16.msra.mxu1 %v4749_v43  ;;  %v4847_v43 = vld [vmem:[%s6827_s1 + $0x78c] ss:$24 sps:$4 sm:$0xff]  }
  0xa8   : > { %2304 = vmatpush1.bf16.msra.mxu0 %v4752_v44  ;;  %2219 = vmatprep.subr.bf16.mxu1 %v4757_v45  ;;  %v4850_v44 = vld [vmem:[%s6827_s1 + $0x494] ss:$24 sps:$4 sm:$0xff]   ;;  %v4845_v45 = vld [vmem:[%s6827_s1 + $0x788] ss:$24 sps:$4 sm:$0xff]  }
  0xa9   : > { %2305 = vmatprep.subr.bf16.mxu0 %v4760_v46  ;;  %v4848_v46 = vld [vmem:[%s6827_s1 + $0x490] ss:$24 sps:$4 sm:$0xff]  }
  0xab   : > { %2220 = vmatpush1.bf16.msra.mxu1 %v4755_v47  ;;  %v4853_v47 = vld [vmem:[%s6827_s1 + $0x7bc] ss:$24 sps:$4 sm:$0xff]  }
  0xac   : > { %2306 = vmatpush1.bf16.msra.mxu0 %v4758_v48  ;;  %2221 = vmatprep.subr.bf16.mxu1 %v4763_v51  ;;  %v4856_v48 = vld [vmem:[%s6827_s1 + $0x4c4] ss:$24 sps:$4 sm:$0xff]   ;;  %v4851_v51 = vld [vmem:[%s6827_s1 + $0x7b8] ss:$24 sps:$4 sm:$0xff]  }
  0xad   : > { %2307 = vmatprep.subr.bf16.mxu0 %v4766_v52  ;;  %v4854_v52 = vld [vmem:[%s6827_s1 + $0x4c0] ss:$24 sps:$4 sm:$0xff]  }
  0xaf   : > { %2222 = vmatpush1.bf16.msra.mxu1 %v4761_v53  ;;  %v4859_v53 = vld [vmem:[%s6827_s1 + $0x7ec] ss:$24 sps:$4 sm:$0xff]  }
  0xb0   : > { %2308 = vmatpush1.bf16.msra.mxu0 %v4764_v54  ;;  %2223 = vmatprep.subr.bf16.mxu1 %v4769_v55  ;;  %v4862_v54 = vld [vmem:[%s6827_s1 + $0x4f4] ss:$24 sps:$4 sm:$0xff]   ;;  %v4857_v55 = vld [vmem:[%s6827_s1 + $0x7e8] ss:$24 sps:$4 sm:$0xff]  }
  0xb1   : > { %2309 = vmatprep.subr.bf16.mxu0 %v4772_v56  ;;  %v4860_v56 = vld [vmem:[%s6827_s1 + $0x4f0] ss:$24 sps:$4 sm:$0xff]  }
  0xb3   : > { %2224 = vmatpush1.bf16.msra.mxu1 %v4767_v57  ;;  %v4865_v57 = vld [vmem:[%s6827_s1 + $0x81c] ss:$24 sps:$4 sm:$0xff]  }
  0xb4   : > { %2310 = vmatpush1.bf16.msra.mxu0 %v4770_v58  ;;  %2225 = vmatprep.subr.bf16.mxu1 %v4775_v59  ;;  %v4868_v58 = vld [vmem:[%s6827_s1 + $0x524] ss:$24 sps:$4 sm:$0xff]   ;;  %v4863_v59 = vld [vmem:[%s6827_s1 + $0x818] ss:$24 sps:$4 sm:$0xff]  }
  0xb5   : > { %2311 = vmatprep.subr.bf16.mxu0 %v4778_v60  ;;  %v4866_v60 = vld [vmem:[%s6827_s1 + $0x520] ss:$24 sps:$4 sm:$0xff]  }
  0xb7   : > { %2226 = vmatpush1.bf16.msra.mxu1 %v4773_v61  ;;  %v4871_v61 = vld [vmem:[%s6827_s1 + $0x84c] ss:$24 sps:$4 sm:$0xff]  }
  0xb8   : > { %2312 = vmatpush1.bf16.msra.mxu0 %v4776_v62  ;;  %2227 = vmatprep.subr.bf16.mxu1 %v4781_v63  ;;  %v4874_v62 = vld [vmem:[%s6827_s1 + $0x554] ss:$24 sps:$4 sm:$0xff]   ;;  %v4869_v63 = vld [vmem:[%s6827_s1 + $0x848] ss:$24 sps:$4 sm:$0xff]  }
  0xb9   : > { %2313 = vmatprep.subr.bf16.mxu0 %v4784_v0  ;;  %v4872_v0 = vld [vmem:[%s6827_s1 + $0x550] ss:$24 sps:$4 sm:$0xff]  }
  0xbb   : > { %2228 = vmatpush1.bf16.msra.mxu1 %v4779_v1  ;;  %v4877_v1 = vld [vmem:[%s6827_s1 + $0x87c] ss:$24 sps:$4 sm:$0xff]  }
  0xbc   : > { %2314 = vmatpush1.bf16.msra.mxu0 %v4782_v2  ;;  %2229 = vmatprep.subr.bf16.mxu1 %v4787_v3  ;;  %v4880_v2 = vld [vmem:[%s6827_s1 + $0x584] ss:$24 sps:$4 sm:$0xff]   ;;  %v4875_v3 = vld [vmem:[%s6827_s1 + $0x878] ss:$24 sps:$4 sm:$0xff]  }
  0xbd   : > { %2315 = vmatprep.subr.bf16.mxu0 %v4790_v5  ;;  %v4878_v5 = vld [vmem:[%s6827_s1 + $0x580] ss:$24 sps:$4 sm:$0xff]  }
  0xbf   : > { %2230 = vmatpush1.bf16.msra.mxu1 %v4785_v6  ;;  %v4883_v6 = vld [vmem:[%s6827_s1 + $0x8ac] ss:$24 sps:$4 sm:$0xff]  }
  0xc0   : > { %2316 = vmatpush1.bf16.msra.mxu0 %v4788_v8  ;;  %2231 = vmatprep.subr.bf16.mxu1 %v4793_v9  ;;  %v4886_v8 = vld [vmem:[%s6827_s1 + $0x5b4] ss:$24 sps:$4 sm:$0xff]   ;;  %v4881_v9 = vld [vmem:[%s6827_s1 + $0x8a8] ss:$24 sps:$4 sm:$0xff]  }
  0xc1   : > { %2317 = vmatprep.subr.bf16.mxu0 %v4796_v10  ;;  %v4884_v10 = vld [vmem:[%s6827_s1 + $0x5b0] ss:$24 sps:$4 sm:$0xff]  }
  0xc3   : > { %2232 = vmatpush1.bf16.msra.mxu1 %v4791_v12  ;;  %v4889_v12 = vld [vmem:[%s6827_s1 + $0x8dc] ss:$24 sps:$4 sm:$0xff]  }
  0xc4   : > { %2318 = vmatpush1.bf16.msra.mxu0 %v4794_v13  ;;  %2244 = vmatprep.subr.bf16.mxu1 %v4799_v14  ;;  %v4892_v13 = vld [vmem:[%s6827_s1 + $0x5e4] ss:$24 sps:$4 sm:$0xff]   ;;  %v4887_v14 = vld [vmem:[%s6827_s1 + $0x8d8] ss:$24 sps:$4 sm:$0xff]  }
  0xc5   : > { %2330 = vmatprep.subr.bf16.mxu0 %v4802_v15  ;;  %v4890_v15 = vld [vmem:[%s6827_s1 + $0x5e0] ss:$24 sps:$4 sm:$0xff]  }
  0xc6   : > { %2234 = vmatmul.mubr.bf16.vlgmr.msra.gmra.mrb[4].mxu1 %v5505_v7  ;;  %v5229_v7 = vld [vmem:[%s5422_s21 + $0xc] ss:$24 sps:$4 sm:$0xff]  }
  0xc7   : > { %2320 = vmatmul.mubr.bf16.vlgmr.msra.gmra.mrb[4].mxu0 %v5496_v4  ;;  %2245 = vmatpush1.bf16.msra.mxu1 %v4797_v16  ;;  %v4814_v4 = vld [vmem:[%s6827_s1 + $0x374] ss:$24 sps:$4 sm:$0xff]  }
  0xc8   : > { %2331 = vmatpush1.bf16.msra.mxu0 %v4800_v17  ;;  %2246 = vmatprep.subr.bf16.mxu1 %v4805_v18  ;;  %v4895_v16 = vld [vmem:[%s6827_s1 + $0x614] ss:$24 sps:$4 sm:$0xff]   ;;  %v4893_v18 = vld [vmem:[%s6827_s1 + $0x610] ss:$24 sps:$4 sm:$0xff]  }
  0xc9   : > { %2332 = vmatprep.subr.bf16.mxu0 %v4808_v19  ;;  %2276 = vmatprep.mubr.bf16.mxu1 %v5589_v34  ;;  %v4820_v34 = vld [vmem:[%s6827_s1 + $0x3a4] ss:$24 sps:$4 sm:$0xff]   ;;  %v4917_v19 = vld [vmem:[%s6829_s3] ss:$16 sps:$4 sm:$0xff]  }
  0xca   : > { %2362 = vmatprep.mubr.bf16.mxu0 %v5229_v7  ;;  %v4919_v17 = vld [vmem:[%s6829_s3 + $0x4] ss:$16 sps:$4 sm:$0xff]   ;;  %v4923_v7 = vld [vmem:[%s6829_s3 + $0x20] ss:$16 sps:$4 sm:$0xff]  }
  0xcb   : > { %2247 = vmatpush1.bf16.msra.mxu1 %v4803_v20  ;;  %v4898_v20 = vld [vmem:[%s6827_s1 + $0x644] ss:$24 sps:$4 sm:$0xff]  }
  0xcc   : > { %2333 = vmatpush1.bf16.msra.mxu0 %v4806_v21  ;;  %2248 = vmatprep.subr.bf16.mxu1 %v4811_v22  ;;  %v4925_v21 = vld [vmem:[%s6829_s3 + $0x24] ss:$16 sps:$4 sm:$0xff]   ;;  %v5230_v22 = vld [vmem:[%s5422_s21 + $0x8] ss:$24 sps:$4 sm:$0xff]  }
  0xcd   : > { %2334 = vmatprep.subr.bf16.mxu0 %v4814_v4  ;;  %v4896_v4 = vld [vmem:[%s6827_s1 + $0x640] ss:$24 sps:$4 sm:$0xff]  }
  0xcf   : > { %2249 = vmatpush1.bf16.msra.mxu1 %v4809_v49  ;;  %v4901_v49 = vld [vmem:[%s6827_s1 + $0x674] ss:$24 sps:$4 sm:$0xff]  }
  0xd0   : > { %2335 = vmatpush1.bf16.msra.mxu0 %v4812_v50  ;;  %2250 = vmatprep.subr.bf16.mxu1 %v4817_v23  ;;  %v5231_v50 = vld [vmem:[%s5422_s21 + $0x14] ss:$24 sps:$4 sm:$0xff]   ;;  %v4899_v23 = vld [vmem:[%s6827_s1 + $0x670] ss:$24 sps:$4 sm:$0xff]  }
  0xd1   : > { %2336 = vmatprep.subr.bf16.mxu0 %v4820_v34  ;;  %v4904_v34 = vld [vmem:[%s6827_s1 + $0x6a4] ss:$24 sps:$4 sm:$0xff]  }
  0xd3   : > { %2251 = vmatpush1.bf16.msra.mxu1 %v4815_v24  ;;  %v4929_v24 = vld [vmem:[%s6829_s3 + $0x40] ss:$16 sps:$4 sm:$0xff]  }
  0xd4   : > { %2337 = vmatpush1.bf16.msra.mxu0 %v4818_v25  ;;  %2252 = vmatprep.subr.bf16.mxu1 %v4823_v26  ;;  %v4937_v25 = vld [vmem:[%s6829_s3 + $0x64] ss:$16 sps:$4 sm:$0xff]   ;;  %v4902_v26 = vld [vmem:[%s6827_s1 + $0x6a0] ss:$24 sps:$4 sm:$0xff]  }
  0xd5   : > { %2338 = vmatprep.subr.bf16.mxu0 %v4826_v27  ;;  %v4907_v27 = vld [vmem:[%s6827_s1 + $0x6d4] ss:$24 sps:$4 sm:$0xff]  }
  0xd7   : > { %2253 = vmatpush1.bf16.msra.mxu1 %v4821_v28  ;;  %v4935_v28 = vld [vmem:[%s6829_s3 + $0x60] ss:$16 sps:$4 sm:$0xff]  }
  0xd8   : > { %2339 = vmatpush1.bf16.msra.mxu0 %v4824_v29  ;;  %2254 = vmatprep.subr.bf16.mxu1 %v4829_v30  ;;  %v4943_v29 = vld [vmem:[%s6829_s3 + $0x84] ss:$16 sps:$4 sm:$0xff]   ;;  %v4905_v30 = vld [vmem:[%s6827_s1 + $0x6d0] ss:$24 sps:$4 sm:$0xff]  }
  0xd9   : > { %2340 = vmatprep.subr.bf16.mxu0 %v4832_v31  ;;  %v4910_v31 = vld [vmem:[%s6827_s1 + $0x704] ss:$24 sps:$4 sm:$0xff]  }
  0xdb   : > { %2255 = vmatpush1.bf16.msra.mxu1 %v4827_v32  ;;  %v4941_v32 = vld [vmem:[%s6829_s3 + $0x80] ss:$16 sps:$4 sm:$0xff]  }
  0xdc   : > { %2341 = vmatpush1.bf16.msra.mxu0 %v4830_v33  ;;  %2256 = vmatprep.subr.bf16.mxu1 %v4835_v35  ;;  %v4949_v33 = vld [vmem:[%s6829_s3 + $0xa4] ss:$16 sps:$4 sm:$0xff]   ;;  %v4908_v35 = vld [vmem:[%s6827_s1 + $0x700] ss:$24 sps:$4 sm:$0xff]  }
  0xdd   : > { %2342 = vmatprep.subr.bf16.mxu0 %v4838_v36  ;;  %v4913_v36 = vld [vmem:[%s6827_s1 + $0x734] ss:$24 sps:$4 sm:$0xff]  }
  0xdf   : > { %2257 = vmatpush1.bf16.msra.mxu1 %v4833_v37  ;;  %v4947_v37 = vld [vmem:[%s6829_s3 + $0xa0] ss:$16 sps:$4 sm:$0xff]  }
  0xe0   : > { %2343 = vmatpush1.bf16.msra.mxu0 %v4836_v38  ;;  %2258 = vmatprep.subr.bf16.mxu1 %v4841_v39  ;;  %v4955_v38 = vld [vmem:[%s6829_s3 + $0xc4] ss:$16 sps:$4 sm:$0xff]  }
  0xe1   : > { %2344 = vmatprep.subr.bf16.mxu0 %v4844_v40 }
  0xe3   : > { %2259 = vmatpush1.bf16.msra.mxu1 %v4839_v41 }
  0xe4   : > { %2345 = vmatpush1.bf16.msra.mxu0 %v4842_v42  ;;  %2260 = vmatprep.subr.bf16.mxu1 %v4847_v43  ;;  %v4911_v42 = vld [vmem:[%s6827_s1 + $0x730] ss:$24 sps:$4 sm:$0xff]  }
  0xe5   : > { %2346 = vmatprep.subr.bf16.mxu0 %v4850_v44  ;;  %v4953_v43 = vld [vmem:[%s6829_s3 + $0xc0] ss:$16 sps:$4 sm:$0xff]  }
  0xe7   : > { %2261 = vmatpush1.bf16.msra.mxu1 %v4845_v45  ;;  %v4916_v45 = vld [vmem:[%s6827_s1 + $0x764] ss:$24 sps:$4 sm:$0xff]  }
  0xe8   : > { %2347 = vmatpush1.bf16.msra.mxu0 %v4848_v46  ;;  %2262 = vmatprep.subr.bf16.mxu1 %v4853_v47  ;;  %v4961_v46 = vld [vmem:[%s6829_s3 + $0xe4] ss:$16 sps:$4 sm:$0xff]   ;;  %v4914_v47 = vld [vmem:[%s6827_s1 + $0x760] ss:$24 sps:$4 sm:$0xff]  }
  0xe9   : > { %2348 = vmatprep.subr.bf16.mxu0 %v4856_v48  ;;  %v4922_v48 = vld [vmem:[%s6827_s1 + $0x794] ss:$24 sps:$4 sm:$0xff]  }
  0xeb   : > { %2263 = vmatpush1.bf16.msra.mxu1 %v4851_v51  ;;  %v4959_v51 = vld [vmem:[%s6829_s3 + $0xe0] ss:$16 sps:$4 sm:$0xff]  }
  0xec   : > { %2349 = vmatpush1.bf16.msra.mxu0 %v4854_v52  ;;  %2264 = vmatprep.subr.bf16.mxu1 %v4859_v53  ;;  %v4967_v52 = vld [vmem:[%s6829_s3 + $0x104] ss:$16 sps:$4 sm:$0xff]   ;;  %v4920_v53 = vld [vmem:[%s6827_s1 + $0x790] ss:$24 sps:$4 sm:$0xff]  }
  0xed   : > { %2350 = vmatprep.subr.bf16.mxu0 %v4862_v54  ;;  %v4928_v54 = vld [vmem:[%s6827_s1 + $0x7c4] ss:$24 sps:$4 sm:$0xff]  }
  0xef   : > { %2265 = vmatpush1.bf16.msra.mxu1 %v4857_v55  ;;  %v4965_v55 = vld [vmem:[%s6829_s3 + $0x100] ss:$16 sps:$4 sm:$0xff]  }
  0xf0   : > { %2351 = vmatpush1.bf16.msra.mxu0 %v4860_v56  ;;  %2266 = vmatprep.subr.bf16.mxu1 %v4865_v57  ;;  %v4973_v56 = vld [vmem:[%s6829_s3 + $0x124] ss:$16 sps:$4 sm:$0xff]   ;;  %v4926_v57 = vld [vmem:[%s6827_s1 + $0x7c0] ss:$24 sps:$4 sm:$0xff]  }
  0xf1   : > { %2352 = vmatprep.subr.bf16.mxu0 %v4868_v58  ;;  %v4934_v58 = vld [vmem:[%s6827_s1 + $0x7f4] ss:$24 sps:$4 sm:$0xff]  }
  0xf3   : > { %2267 = vmatpush1.bf16.msra.mxu1 %v4863_v59  ;;  %v4971_v59 = vld [vmem:[%s6829_s3 + $0x120] ss:$16 sps:$4 sm:$0xff]  }
  0xf4   : > { %2353 = vmatpush1.bf16.msra.mxu0 %v4866_v60  ;;  %2268 = vmatprep.subr.bf16.mxu1 %v4871_v61  ;;  %v4979_v60 = vld [vmem:[%s6829_s3 + $0x144] ss:$16 sps:$4 sm:$0xff]   ;;  %v4932_v61 = vld [vmem:[%s6827_s1 + $0x7f0] ss:$24 sps:$4 sm:$0xff]  }
  0xf5   : > { %2354 = vmatprep.subr.bf16.mxu0 %v4874_v62  ;;  %v4977_v62 = vld [vmem:[%s6829_s3 + $0x140] ss:$16 sps:$4 sm:$0xff]  }
  0xf7   : > { %2269 = vmatpush1.bf16.msra.mxu1 %v4869_v63  ;;  %v4940_v63 = vld [vmem:[%s6827_s1 + $0x824] ss:$24 sps:$4 sm:$0xff]  }
  0xf8   : > { %2355 = vmatpush1.bf16.msra.mxu0 %v4872_v0  ;;  %2270 = vmatprep.subr.bf16.mxu1 %v4877_v1  ;;  %v4985_v0 = vld [vmem:[%s6829_s3 + $0x164] ss:$16 sps:$4 sm:$0xff]   ;;  %v4938_v1 = vld [vmem:[%s6827_s1 + $0x820] ss:$24 sps:$4 sm:$0xff]  }
  0xf9   : > { %2356 = vmatprep.subr.bf16.mxu0 %v4880_v2  ;;  %v4983_v2 = vld [vmem:[%s6829_s3 + $0x160] ss:$16 sps:$4 sm:$0xff]  }
  0xfb   : > { %2271 = vmatpush1.bf16.msra.mxu1 %v4875_v3  ;;  %v4946_v3 = vld [vmem:[%s6827_s1 + $0x854] ss:$24 sps:$4 sm:$0xff]  }
  0xfc   : > { %2357 = vmatpush1.bf16.msra.mxu0 %v4878_v5  ;;  %2272 = vmatprep.subr.bf16.mxu1 %v4883_v6  ;;  %v4991_v5 = vld [vmem:[%s6829_s3 + $0x184] ss:$16 sps:$4 sm:$0xff]   ;;  %v4944_v6 = vld [vmem:[%s6827_s1 + $0x850] ss:$24 sps:$4 sm:$0xff]  }
  0xfd   : > { %2358 = vmatprep.subr.bf16.mxu0 %v4886_v8  ;;  %v4989_v8 = vld [vmem:[%s6829_s3 + $0x180] ss:$16 sps:$4 sm:$0xff]  }
  0xff   : > { %2273 = vmatpush1.bf16.msra.mxu1 %v4881_v9  ;;  %v4952_v9 = vld [vmem:[%s6827_s1 + $0x884] ss:$24 sps:$4 sm:$0xff]  }
 0x100   : > { %2359 = vmatpush1.bf16.msra.mxu0 %v4884_v10  ;;  %2274 = vmatprep.subr.bf16.mxu1 %v4889_v12  ;;  %v4997_v10 = vld [vmem:[%s6829_s3 + $0x1a4] ss:$16 sps:$4 sm:$0xff]   ;;  %v4950_v12 = vld [vmem:[%s6827_s1 + $0x880] ss:$24 sps:$4 sm:$0xff]  }
 0x101   : > { %2360 = vmatprep.subr.bf16.mxu0 %v4892_v13  ;;  %v4995_v13 = vld [vmem:[%s6829_s3 + $0x1a0] ss:$16 sps:$4 sm:$0xff]  }
 0x103   : > { %2275 = vmatpush1.bf16.msra.mxu1 %v4887_v14  ;;  %v4958_v14 = vld [vmem:[%s6827_s1 + $0x8b4] ss:$24 sps:$4 sm:$0xff]  }
 0x104   : > { %2361 = vmatpush1.bf16.msra.mxu0 %v4890_v15  ;;  %3608 = vmatprep.subr.bf16.mxu1 %v4919_v17  ;;  %v5003_v15 = vld [vmem:[%s6829_s3 + $0x1c4] ss:$16 sps:$4 sm:$0xff]   ;;  %v5001_v17 = vld [vmem:[%s6829_s3 + $0x1c0] ss:$16 sps:$4 sm:$0xff]  }
 0x105   : > { %2373 = vmatprep.subr.bf16.mxu0 %v4895_v16  ;;  %v4956_v16 = vld [vmem:[%s6827_s1 + $0x8b0] ss:$24 sps:$4 sm:$0xff]  }
 0x106   : > { %2277 = vmatmul.mubr.bf16.vlgmr.msra.gmra.mrb[4].mxu1 %v5701_v11  ;;  %v4931_v11 = vld [vmem:[%s6829_s3 + $0x44] ss:$16 sps:$4 sm:$0xff]  }
 0x107   : > { %2363 = vmatmul.mubr.bf16.vlgmr.msra.gmra.mrb[4].mxu0 %v5230_v22  ;;  %3609 = vmatpush1.bf16.msra.mxu1 %v4917_v19  ;;  %v5009_v19 = vld [vmem:[%s6829_s3 + $0x1e4] ss:$16 sps:$4 sm:$0xff]   ;;  %v4970_v22 = vld [vmem:[%s6829_s3 + $0xc] ss:$16 sps:$4 sm:$0xff]  }
 0x108   : > { %2374 = vmatpush1.bf16.msra.mxu0 %v4893_v18  ;;  %3610 = vmatprep.subr.bf16.mxu1 %v4925_v21  ;;  %v4964_v18 = vld [vmem:[%s6827_s1 + $0x8e4] ss:$24 sps:$4 sm:$0xff]   ;;  %v5007_v21 = vld [vmem:[%s6829_s3 + $0x1e0] ss:$16 sps:$4 sm:$0xff]  }
 0x109   : > { %2375 = vmatprep.subr.bf16.mxu0 %v4898_v20  ;;  %2405 = vmatprep.mubr.bf16.mxu0 %v5231_v50  ;;  %v4962_v20 = vld [vmem:[%s6827_s1 + $0x8e0] ss:$24 sps:$4 sm:$0xff]  }
 0x10a   : > { %v4974_v50 = vld [vmem:[%s6829_s3 + $0x28] ss:$16 sps:$4 sm:$0xff]  }
 0x10b   : > { %3611 = vmatpush1.bf16.msra.mxu1 %v4923_v7  ;;  %v4968_v7 = vld [vmem:[%s6829_s3 + $0x8] ss:$16 sps:$4 sm:$0xff]  }
 0x10c   : > { %2376 = vmatpush1.bf16.msra.mxu0 %v4896_v4  ;;  %3612 = vmatprep.subr.bf16.mxu1 %v4931_v11  ;;  %v5039_v4 = vld [vmem:[%s6829_s3 + $0x204] ss:$16 sps:$4 sm:$0xff]   ;;  %v5232_v11 = vld [vmem:[%s5422_s21 + $0x10] ss:$24 sps:$4 sm:$0xff]  }
 0x10d   : > { %2377 = vmatprep.subr.bf16.mxu0 %v4901_v49  ;;  %v4976_v49 = vld [vmem:[%s6829_s3 + $0x2c] ss:$16 sps:$4 sm:$0xff]  }
 0x10f   : > { %3613 = vmatpush1.bf16.msra.mxu1 %v4929_v24  ;;  %v4980_v24 = vld [vmem:[%s6829_s3 + $0x48] ss:$16 sps:$4 sm:$0xff]  }
 0x110   : > { %2378 = vmatpush1.bf16.msra.mxu0 %v4899_v23  ;;  %3614 = vmatprep.subr.bf16.mxu1 %v4937_v25  ;;  %v529_v23 = vlaneseq }
 0x111   : > { %2379 = vmatprep.subr.bf16.mxu0 %v4904_v34  ;;  %v4982_v34 = vld [vmem:[%s6829_s3 + $0x4c] ss:$16 sps:$4 sm:$0xff]  }
 0x112   : > { %v6314_v25 = vshrl.u32 %v529_v23, 7  ;;  %v5031_v23 = vld [vmem:[%s6829_s3 + $0x1c8] ss:$16 sps:$4 sm:$0xff]  }
 0x113   : > { %3615 = vmatpush1.bf16.msra.mxu1 %v4935_v28 }
 0x114   : > { %2380 = vmatpush1.bf16.msra.mxu0 %v4902_v26  ;;  %3616 = vmatprep.subr.bf16.mxu1 %v4943_v29  ;;  %v4988_v26 = vld [vmem:[%s6829_s3 + $0x6c] ss:$16 sps:$4 sm:$0xff]   ;;  %v531_v28 = vsub.s32 0, %v6314_v25 }
 0x115   : > { %2381 = vmatprep.subr.bf16.mxu0 %v4907_v27  ;;  %v4986_v27 = vld [vmem:[%s6829_s3 + $0x68] ss:$16 sps:$4 sm:$0xff]   ;;  %v4994_v29 = vld [vmem:[%s6829_s3 + $0x8c] ss:$16 sps:$4 sm:$0xff]  }
 0x117   : > { %3617 = vmatpush1.bf16.msra.mxu1 %v4941_v32  ;;  %v4992_v32 = vld [vmem:[%s6829_s3 + $0x88] ss:$16 sps:$4 sm:$0xff]  }
 0x118   : > { %2382 = vmatpush1.bf16.msra.mxu0 %v4905_v30  ;;  %3618 = vmatprep.subr.bf16.mxu1 %v4949_v33  ;;  %v6329_v30 = vld [vmem:[%s6828_s2] sm:$0x3f] }
 0x119   : > { %2383 = vmatprep.subr.bf16.mxu0 %v4910_v31  ;;  %v6170_v39 = vpop.f32.mrb[0].mxu1  ;;  %v535_v31 = vsub.s32 1, %v6314_v25  ;;  %v532_v33 = vrot.slane %v6329_v30, %v531_v28 }
 0x11a   : > { %v6172_v40 = vpop.f32.mrb[1].mxu1 }
 0x11b   : > { %v6174_v41 = vpop.f32.mrb[2].mxu1  ;;  %3619 = vmatpush1.bf16.msra.mxu1 %v4947_v37  ;;  %v4998_v37 = vld [vmem:[%s6829_s3 + $0xa8] ss:$16 sps:$4 sm:$0xff]  }
 0x11c   : > { %2384 = vmatpush1.bf16.msra.mxu0 %v4908_v35  ;;  %v6182_v44 = vpop.f32.mrb[3].mxu1  ;;  %3620 = vmatprep.subr.bf16.mxu1 %v4955_v38  ;;  %v5000_v35 = vld [vmem:[%s6829_s3 + $0xac] ss:$16 sps:$4 sm:$0xff]   ;;  %v2064_v38 = vadd.f32 %v6170_v39, %v532_v33  ;;  %v5004_v39 = vld [vmem:[%s6829_s3 + $0xc8] ss:$16 sps:$4 sm:$0xff]  }
 0x11d   : > { %2385 = vmatprep.subr.bf16.mxu0 %v4913_v36  ;;  %v536_v36 = vrot.slane %v6329_v30, %v535_v31 }
 0x11f   : > { %3621 = vmatpush1.bf16.msra.mxu1 %v4953_v43  ;;  %v2066_v43 = vadd.f32 %v6172_v40, %v536_v36  ;;  %v5012_v40 = vld [vmem:[%s6829_s3 + $0xec] ss:$16 sps:$4 sm:$0xff]  }
 0x120   : > { %2386 = vmatpush1.bf16.msra.mxu0 %v4911_v42  ;;  %3622 = vmatprep.subr.bf16.mxu1 %v4961_v46  ;;  %v5006_v42 = vld [vmem:[%s6829_s3 + $0xcc] ss:$16 sps:$4 sm:$0xff]   ;;  %v2068_v46 = vadd.f32 %v6174_v41, %v532_v33  ;;  %v5093_v33 = vld [vmem:[%s6829_s3 + $0x324] ss:$16 sps:$4 sm:$0xff]  }
 0x121   : > { %2387 = vmatprep.subr.bf16.mxu0 %v4916_v45 }
 0x123   : > { %3623 = vmatpush1.bf16.msra.mxu1 %v4959_v51  ;;  %v2070_v51 = vadd.f32 %v6182_v44, %v536_v36  ;;  %v5010_v44 = vld [vmem:[%s6829_s3 + $0xe8] ss:$16 sps:$4 sm:$0xff]   ;;  %v5048_v36 = vld [vmem:[%s6829_s3 + $0x22c] ss:$16 sps:$4 sm:$0xff]  }
 0x124   : > { %2388 = vmatpush1.bf16.msra.mxu0 %v4914_v47  ;;  %3624 = vmatprep.subr.bf16.mxu1 %v4967_v52 }
 0x125   : > { %2389 = vmatprep.subr.bf16.mxu0 %v4922_v48 }
 0x127   : > { %3625 = vmatpush1.bf16.msra.mxu1 %v4965_v55 }
 0x128   : > { %2390 = vmatpush1.bf16.msra.mxu0 %v4920_v53  ;;  %3626 = vmatprep.subr.bf16.mxu1 %v4973_v56 }
 0x129   : > { %2391 = vmatprep.subr.bf16.mxu0 %v4928_v54 }
 0x12b   : > { %3627 = vmatpush1.bf16.msra.mxu1 %v4971_v59 }
 0x12c   : > { %2392 = vmatpush1.bf16.msra.mxu0 %v4926_v57  ;;  %3628 = vmatprep.subr.bf16.mxu1 %v4979_v60 }
 0x12d   : > { %2393 = vmatprep.subr.bf16.mxu0 %v4934_v58 }
 0x12f   : > { %3629 = vmatpush1.bf16.msra.mxu1 %v4977_v62  ;;  %v5015_v62 = vld [vmem:[%s6829_s3 + $0x10c] ss:$16 sps:$4 sm:$0xff]  }
 0x130   : > { %2394 = vmatpush1.bf16.msra.mxu0 %v4932_v61  ;;  %3630 = vmatprep.subr.bf16.mxu1 %v4985_v0  ;;  %v5045_v0 = vld [vmem:[%s6829_s3 + $0x224] ss:$16 sps:$4 sm:$0xff]  }
 0x131   : > { %2395 = vmatprep.subr.bf16.mxu0 %v4940_v63  ;;  %v5037_v63 = vld [vmem:[%s6829_s3 + $0x200] ss:$16 sps:$4 sm:$0xff]  }
 0x133   : > { %3631 = vmatpush1.bf16.msra.mxu1 %v4983_v2  ;;  %v5018_v2 = vld [vmem:[%s6829_s3 + $0x12c] ss:$16 sps:$4 sm:$0xff]  }
 0x134   : > { %2396 = vmatpush1.bf16.msra.mxu0 %v4938_v1  ;;  %3632 = vmatprep.subr.bf16.mxu1 %v4991_v5  ;;  %v5013_v1 = vld [vmem:[%s6829_s3 + $0x108] ss:$16 sps:$4 sm:$0xff]   ;;  %v5051_v5 = vld [vmem:[%s6829_s3 + $0x244] ss:$16 sps:$4 sm:$0xff]  }
 0x135   : > { %2397 = vmatprep.subr.bf16.mxu0 %v4946_v3  ;;  %v5043_v3 = vld [vmem:[%s6829_s3 + $0x220] ss:$16 sps:$4 sm:$0xff]  }
 0x137   : > { %3633 = vmatpush1.bf16.msra.mxu1 %v4989_v8  ;;  %v5021_v8 = vld [vmem:[%s6829_s3 + $0x14c] ss:$16 sps:$4 sm:$0xff]  }
 0x138   : > { %2398 = vmatpush1.bf16.msra.mxu0 %v4944_v6  ;;  %3634 = vmatprep.subr.bf16.mxu1 %v4997_v10  ;;  %v5016_v6 = vld [vmem:[%s6829_s3 + $0x128] ss:$16 sps:$4 sm:$0xff]   ;;  %v5057_v10 = vld [vmem:[%s6829_s3 + $0x264] ss:$16 sps:$4 sm:$0xff]  }
 0x139   : > { %2399 = vmatprep.subr.bf16.mxu0 %v4952_v9  ;;  %v5049_v9 = vld [vmem:[%s6829_s3 + $0x240] ss:$16 sps:$4 sm:$0xff]  }
 0x13b   : > { %3635 = vmatpush1.bf16.msra.mxu1 %v4995_v13  ;;  %v5024_v13 = vld [vmem:[%s6829_s3 + $0x16c] ss:$16 sps:$4 sm:$0xff]  }
 0x13c   : > { %2400 = vmatpush1.bf16.msra.mxu0 %v4950_v12  ;;  %3636 = vmatprep.subr.bf16.mxu1 %v5003_v15  ;;  %v5019_v12 = vld [vmem:[%s6829_s3 + $0x148] ss:$16 sps:$4 sm:$0xff]   ;;  %v5063_v15 = vld [vmem:[%s6829_s3 + $0x284] ss:$16 sps:$4 sm:$0xff]  }
 0x13d   : > { %2401 = vmatprep.subr.bf16.mxu0 %v4958_v14  ;;  %v5055_v14 = vld [vmem:[%s6829_s3 + $0x260] ss:$16 sps:$4 sm:$0xff]  }
 0x13f   : > { %3637 = vmatpush1.bf16.msra.mxu1 %v5001_v17  ;;  %v5027_v17 = vld [vmem:[%s6829_s3 + $0x18c] ss:$16 sps:$4 sm:$0xff]  }
 0x140   : > { %2402 = vmatpush1.bf16.msra.mxu0 %v4956_v16  ;;  %3638 = vmatprep.subr.bf16.mxu1 %v5009_v19  ;;  %v5022_v16 = vld [vmem:[%s6829_s3 + $0x168] ss:$16 sps:$4 sm:$0xff]   ;;  %v5069_v19 = vld [vmem:[%s6829_s3 + $0x2a4] ss:$16 sps:$4 sm:$0xff]  }
 0x141   : > { %2403 = vmatprep.subr.bf16.mxu0 %v4964_v18  ;;  %v5061_v18 = vld [vmem:[%s6829_s3 + $0x280] ss:$16 sps:$4 sm:$0xff]  }
 0x143   : > { %3639 = vmatpush1.bf16.msra.mxu1 %v5007_v21  ;;  %v5030_v21 = vld [vmem:[%s6829_s3 + $0x1ac] ss:$16 sps:$4 sm:$0xff]  }
 0x144   : > { %2404 = vmatpush1.bf16.msra.mxu0 %v4962_v20  ;;  %3651 = vmatprep.subr.bf16.mxu1 %v5039_v4  ;;  %v5025_v20 = vld [vmem:[%s6829_s3 + $0x188] ss:$16 sps:$4 sm:$0xff]   ;;  %v5075_v4 = vld [vmem:[%s6829_s3 + $0x2c4] ss:$16 sps:$4 sm:$0xff]  }
 0x145   : > { %3737 = vmatprep.subr.bf16.mxu0 %v4970_v22  ;;  %v5067_v22 = vld [vmem:[%s6829_s3 + $0x2a0] ss:$16 sps:$4 sm:$0xff]  }
 0x147   : > { %2406 = vmatmul.mubr.bf16.vlgmr.msra.gmra.mrb[4].mxu0 %v5232_v11  ;;  %v5073_v11 = vld [vmem:[%s6829_s3 + $0x2c0] ss:$16 sps:$4 sm:$0xff]  }
 0x148   : > { %3738 = vmatpush1.bf16.msra.mxu0 %v4968_v7  ;;  %v5028_v7 = vld [vmem:[%s6829_s3 + $0x1a8] ss:$16 sps:$4 sm:$0xff]  }
 0x149   : > { %3739 = vmatprep.subr.bf16.mxu0 %v4976_v49  ;;  %v5033_v49 = vld [vmem:[%s6829_s3 + $0x1cc] ss:$16 sps:$4 sm:$0xff]  }
 0x14c   : > { %3740 = vmatpush1.bf16.msra.mxu0 %v4974_v50  ;;  %v5081_v50 = vld [vmem:[%s6829_s3 + $0x2e4] ss:$16 sps:$4 sm:$0xff]  }
 0x14d   : > { %3741 = vmatprep.subr.bf16.mxu0 %v4982_v34  ;;  %v5036_v34 = vld [vmem:[%s6829_s3 + $0x1ec] ss:$16 sps:$4 sm:$0xff]  }
 0x150   : > { %3742 = vmatpush1.bf16.msra.mxu0 %v4980_v24  ;;  %v5079_v24 = vld [vmem:[%s6829_s3 + $0x2e0] ss:$16 sps:$4 sm:$0xff]  }
 0x151   : > { %3743 = vmatprep.subr.bf16.mxu0 %v4988_v26  ;;  %v5087_v26 = vld [vmem:[%s6829_s3 + $0x304] ss:$16 sps:$4 sm:$0xff]  }
 0x154   : > { %3744 = vmatpush1.bf16.msra.mxu0 %v4986_v27  ;;  %v5034_v27 = vld [vmem:[%s6829_s3 + $0x1e8] ss:$16 sps:$4 sm:$0xff]  }
 0x155   : > { %3745 = vmatprep.subr.bf16.mxu0 %v4994_v29  ;;  %v5042_v29 = vld [vmem:[%s6829_s3 + $0x20c] ss:$16 sps:$4 sm:$0xff]  }
 0x158   : > { %3746 = vmatpush1.bf16.msra.mxu0 %v4992_v32  ;;  %v5085_v32 = vld [vmem:[%s6829_s3 + $0x300] ss:$16 sps:$4 sm:$0xff]  }
 0x159   : > { %3747 = vmatprep.subr.bf16.mxu0 %v5000_v35  ;;  %v5040_v35 = vld [vmem:[%s6829_s3 + $0x208] ss:$16 sps:$4 sm:$0xff]  }
 0x15a   : > { %v2149_v45 = vpop.f32.mrb[0].mxu0 }
 0x15b   : > { %v4432_v47 = vadd.f32 %v2149_v45, %v2064_v38  ;;  %v2151_v48 = vpop.f32.mrb[1].mxu0  ;;  %v5099_v38 = vld [vmem:[%s6829_s3 + $0x344] ss:$16 sps:$4 sm:$0xff]   ;;  %v5097_v45 = vld [vmem:[%s6829_s3 + $0x340] ss:$16 sps:$4 sm:$0xff]  }
 0x15c   : > { %v4434_v52 = vadd.f32 %v2151_v48, %v2066_v43  ;;  %v2153_v53 = vpop.f32.mrb[2].mxu0  ;;  %3748 = vmatpush1.bf16.msra.mxu0 %v4998_v37  ;;  %v5091_v37 = vld [vmem:[%s6829_s3 + $0x320] ss:$16 sps:$4 sm:$0xff]   ;;  %v5054_v43 = vld [vmem:[%s6829_s3 + $0x24c] ss:$16 sps:$4 sm:$0xff]  }
 0x15d   : > { %v4436_v54 = vadd.f32 %v2153_v53, %v2068_v46  ;;  %v2155_v55 = vpop.f32.mrb[3].mxu0  ;;  %3749 = vmatprep.subr.bf16.mxu0 %v5006_v42  ;;  %v2416_v41 = vmax.f32 %v4432_v47, 0.0  ;;  %v5046_v42 = vld [vmem:[%s6829_s3 + $0x228] ss:$16 sps:$4 sm:$0xff]   ;;  %v5105_v46 = vld [vmem:[%s6829_s3 + $0x364] ss:$16 sps:$4 sm:$0xff]  }
 0x15e   : > { %v4438_v56 = vadd.f32 %v2155_v55, %v2070_v51  ;;  %v2417_v58 = vmax.f32 %v4434_v52, 0.0  ;;  %v5052_v47 = vld [vmem:[%s6829_s3 + $0x248] ss:$16 sps:$4 sm:$0xff]   ;;  %v5060_v48 = vld [vmem:[%s6829_s3 + $0x26c] ss:$16 sps:$4 sm:$0xff]  }
 0x15f   : > { %v2422_v57 = vmax.f32 %v4436_v54, 0.0  ;;  %v5103_v51 = vld [vmem:[%s6829_s3 + $0x360] ss:$16 sps:$4 sm:$0xff]   ;;  %v5111_v52 = vld [vmem:[%s6829_s3 + $0x384] ss:$16 sps:$4 sm:$0xff]  }
 0x160   : > { %v2423_v59 = vmax.f32 %v4438_v56, 0.0  ;;  %3750 = vmatpush1.bf16.msra.mxu0 %v5004_v39  ;;  %v5058_v53 = vld [vmem:[%s6829_s3 + $0x268] ss:$16 sps:$4 sm:$0xff]   ;;  %v5066_v39 = vld [vmem:[%s6829_s3 + $0x28c] ss:$16 sps:$4 sm:$0xff]  }
 0x161   : > { %v6363_v60 = vpack.c.bf16 %v2422_v57, %v2416_v41  ;;  %3751 = vmatprep.subr.bf16.mxu0 %v5012_v40  ;;  %v5109_v54 = vld [vmem:[%s6829_s3 + $0x380] ss:$16 sps:$4 sm:$0xff]   ;;  %v5117_v55 = vld [vmem:[%s6829_s3 + $0x3a4] ss:$16 sps:$4 sm:$0xff]   ;;  %v5064_v40 = vld [vmem:[%s6829_s3 + $0x288] ss:$16 sps:$4 sm:$0xff]  }
 0x162   : > { %v2429_v61 = vpack.c.bf16 %v2423_v59, %v2417_v58  ;;  %v5072_v56 = vld [vmem:[%s6829_s3 + $0x2ac] ss:$16 sps:$4 sm:$0xff]   ;;  %v5115_v41 = vld [vmem:[%s6829_s3 + $0x3a0] ss:$16 sps:$4 sm:$0xff]   ;;  %v5123_v57 = vld [vmem:[%s6829_s3 + $0x3c4] ss:$16 sps:$4 sm:$0xff]  }
 0x163   : > { %v5070_v58 = vld [vmem:[%s6829_s3 + $0x2a8] ss:$16 sps:$4 sm:$0xff]   ;;  %v5078_v59 = vld [vmem:[%s6829_s3 + $0x2cc] ss:$16 sps:$4 sm:$0xff]  }
 0x164   : > { %3640 = vmatprep.mubr.bf16.mxu1 %v2429_v61  ;;  %3752 = vmatpush1.bf16.msra.mxu0 %v5010_v44  ;;  %v5121_v44 = vld [vmem:[%s6829_s3 + $0x3c0] ss:$16 sps:$4 sm:$0xff]  }
 0x165   : > { %3769 = vmatprep.mubr.bf16.mxu0 %v2429_v61  ;;  %3641 = vmatmul.mubr.bf16.vlgmr.msra.gmra.mrb[8].mxu1 %v6363_v60  ;;  %v5076_v61 = vld [vmem:[%s6829_s3 + $0x2c8] ss:$16 sps:$4 sm:$0xff]  }
 0x166   : > { %3753 = vmatprep.subr.bf16.mxu0 %v5015_v62  ;;  %3652 = vmatpush1.bf16.msra.mxu1 %v5037_v63  ;;  %v5084_v62 = vld [vmem:[%s6829_s3 + $0x2ec] ss:$16 sps:$4 sm:$0xff]   ;;  %v5127_v63 = vld [vmem:[%s6829_s3 + $0x3e0] ss:$16 sps:$4 sm:$0xff]  }
 0x167   : > { %3653 = vmatprep.subr.bf16.mxu1 %v5045_v0  ;;  %v5135_v0 = vld [vmem:[%s6829_s3 + $0x404] ss:$16 sps:$4 sm:$0xff]  }
 0x168   : > { %3754 = vmatpush1.bf16.msra.mxu0 %v5013_v1  ;;  %v5082_v1 = vld [vmem:[%s6829_s3 + $0x2e8] ss:$16 sps:$4 sm:$0xff]  }
 0x169   : > { %3755 = vmatprep.subr.bf16.mxu0 %v5018_v2  ;;  %v5090_v2 = vld [vmem:[%s6829_s3 + $0x30c] ss:$16 sps:$4 sm:$0xff]  }
 0x16a   : > { %3654 = vmatpush1.bf16.msra.mxu1 %v5043_v3  ;;  %v5088_v3 = vld [vmem:[%s6829_s3 + $0x308] ss:$16 sps:$4 sm:$0xff]  }
 0x16b   : > { %3655 = vmatprep.subr.bf16.mxu1 %v5051_v5  ;;  %v5096_v5 = vld [vmem:[%s6829_s3 + $0x32c] ss:$16 sps:$4 sm:$0xff]  }
 0x16c   : > { %3756 = vmatpush1.bf16.msra.mxu0 %v5016_v6  ;;  %v5094_v6 = vld [vmem:[%s6829_s3 + $0x328] ss:$16 sps:$4 sm:$0xff]  }
 0x16d   : > { %3757 = vmatprep.subr.bf16.mxu0 %v5021_v8  ;;  %v5102_v8 = vld [vmem:[%s6829_s3 + $0x34c] ss:$16 sps:$4 sm:$0xff]  }
 0x16e   : > { %3656 = vmatpush1.bf16.msra.mxu1 %v5049_v9  ;;  %v5100_v9 = vld [vmem:[%s6829_s3 + $0x348] ss:$16 sps:$4 sm:$0xff]  }
 0x16f   : > { %3657 = vmatprep.subr.bf16.mxu1 %v5057_v10  ;;  %v5108_v10 = vld [vmem:[%s6829_s3 + $0x36c] ss:$16 sps:$4 sm:$0xff]  }
 0x170   : > { %3758 = vmatpush1.bf16.msra.mxu0 %v5019_v12  ;;  %v5106_v12 = vld [vmem:[%s6829_s3 + $0x368] ss:$16 sps:$4 sm:$0xff]  }
 0x171   : > { %3759 = vmatprep.subr.bf16.mxu0 %v5024_v13  ;;  %v5114_v13 = vld [vmem:[%s6829_s3 + $0x38c] ss:$16 sps:$4 sm:$0xff]  }
 0x172   : > { %3658 = vmatpush1.bf16.msra.mxu1 %v5055_v14  ;;  %v5112_v14 = vld [vmem:[%s6829_s3 + $0x388] ss:$16 sps:$4 sm:$0xff]  }
 0x173   : > { %3659 = vmatprep.subr.bf16.mxu1 %v5063_v15  ;;  %v5120_v15 = vld [vmem:[%s6829_s3 + $0x3ac] ss:$16 sps:$4 sm:$0xff]  }
 0x174   : > { %3760 = vmatpush1.bf16.msra.mxu0 %v5022_v16  ;;  %v5118_v16 = vld [vmem:[%s6829_s3 + $0x3a8] ss:$16 sps:$4 sm:$0xff]  }
 0x175   : > { %3761 = vmatprep.subr.bf16.mxu0 %v5027_v17  ;;  %v5126_v17 = vld [vmem:[%s6829_s3 + $0x3cc] ss:$16 sps:$4 sm:$0xff]  }
 0x176   : > { %3660 = vmatpush1.bf16.msra.mxu1 %v5061_v18  ;;  %v5124_v18 = vld [vmem:[%s6829_s3 + $0x3c8] ss:$16 sps:$4 sm:$0xff]  }
 0x177   : > { %3661 = vmatprep.subr.bf16.mxu1 %v5069_v19  ;;  %v5132_v19 = vld [vmem:[%s6829_s3 + $0x3ec] ss:$16 sps:$4 sm:$0xff]  }
 0x178   : > { %3762 = vmatpush1.bf16.msra.mxu0 %v5025_v20  ;;  %v5130_v20 = vld [vmem:[%s6829_s3 + $0x3e8] ss:$16 sps:$4 sm:$0xff]  }
 0x179   : > { %3763 = vmatprep.subr.bf16.mxu0 %v5030_v21  ;;  %v5138_v21 = vld [vmem:[%s6829_s3 + $0x40c] ss:$16 sps:$4 sm:$0xff]  }
 0x17a   : > { %3662 = vmatpush1.bf16.msra.mxu1 %v5067_v22  ;;  %v539_v22 = vsub.s32 2, %v6314_v25 }
 0x17b   : > { %3663 = vmatprep.subr.bf16.mxu1 %v5075_v4  ;;  %v543_v4 = vsub.s32 3, %v6314_v25 }
 0x17c   : > { %3764 = vmatpush1.bf16.msra.mxu0 %v5028_v7  ;;  %v540_v7 = vrot.slane %v6329_v30, %v539_v22 }
 0x17d   : > { %3765 = vmatprep.subr.bf16.mxu0 %v5033_v49  ;;  %v544_v49 = vrot.slane %v6329_v30, %v543_v4 }
 0x17e   : > { %3664 = vmatpush1.bf16.msra.mxu1 %v5073_v11 }
 0x17f   : > { %3665 = vmatprep.subr.bf16.mxu1 %v5081_v50 }
 0x180   : > { %3766 = vmatpush1.bf16.msra.mxu0 %v5031_v23 }
 0x181   : > { %3767 = vmatprep.subr.bf16.mxu0 %v5036_v34 }
 0x182   : > { %3666 = vmatpush1.bf16.msra.mxu1 %v5079_v24 }
 0x183   : > { %3667 = vmatprep.subr.bf16.mxu1 %v5087_v26 }
 0x184   : > { %3768 = vmatpush1.bf16.msra.mxu0 %v5034_v27 }
 0x185   : > { %3780 = vmatprep.subr.bf16.mxu0 %v5042_v29 }
 0x186   : > { %3668 = vmatpush1.bf16.msra.mxu1 %v5085_v32 }
 0x187   : > { %3770 = vmatmul.mubr.bf16.vlgmr.msra.gmra.mrb[8].mxu0 %v6363_v60  ;;  %3669 = vmatprep.subr.bf16.mxu1 %v5093_v33  ;;  %v5129_v60 = vld [vmem:[%s6829_s3 + $0x3e4] ss:$16 sps:$4 sm:$0xff]  }
 0x188   : > { %3781 = vmatpush1.bf16.msra.mxu0 %v5040_v35 }
 0x189   : > { %3782 = vmatprep.subr.bf16.mxu0 %v5048_v36 }
 0x18a   : > { %3670 = vmatpush1.bf16.msra.mxu1 %v5091_v37 }
 0x18b   : > { %3671 = vmatprep.subr.bf16.mxu1 %v5099_v38 }
 0x18c   : > { %3783 = vmatpush1.bf16.msra.mxu0 %v5046_v42  ;;  %v5133_v42 = vld [vmem:[%s6829_s3 + $0x400] ss:$16 sps:$4 sm:$0xff]  }
 0x18d   : > { %3784 = vmatprep.subr.bf16.mxu0 %v5054_v43  ;;  %v5136_v43 = vld [vmem:[%s6829_s3 + $0x408] ss:$16 sps:$4 sm:$0xff]  }
 0x18e   : > { %3672 = vmatpush1.bf16.msra.mxu1 %v5097_v45  ;;  %v5141_v45 = vld [vmem:[%s6829_s3 + $0x424] ss:$16 sps:$4 sm:$0xff]  }
 0x18f   : > { %3673 = vmatprep.subr.bf16.mxu1 %v5105_v46  ;;  %v5144_v46 = vld [vmem:[%s6829_s3 + $0x42c] ss:$16 sps:$4 sm:$0xff]  }
 0x190   : > { %3785 = vmatpush1.bf16.msra.mxu0 %v5052_v47  ;;  %v5139_v47 = vld [vmem:[%s6829_s3 + $0x420] ss:$16 sps:$4 sm:$0xff]  }
 0x191   : > { %3786 = vmatprep.subr.bf16.mxu0 %v5060_v48  ;;  %v5142_v48 = vld [vmem:[%s6829_s3 + $0x428] ss:$16 sps:$4 sm:$0xff]  }
 0x192   : > { %3674 = vmatpush1.bf16.msra.mxu1 %v5103_v51  ;;  %v5147_v51 = vld [vmem:[%s6829_s3 + $0x444] ss:$16 sps:$4 sm:$0xff]  }
 0x193   : > { %3675 = vmatprep.subr.bf16.mxu1 %v5111_v52  ;;  %v5150_v52 = vld [vmem:[%s6829_s3 + $0x44c] ss:$16 sps:$4 sm:$0xff]  }
 0x194   : > { %3787 = vmatpush1.bf16.msra.mxu0 %v5058_v53  ;;  %v5145_v53 = vld [vmem:[%s6829_s3 + $0x440] ss:$16 sps:$4 sm:$0xff]  }
 0x195   : > { %3788 = vmatprep.subr.bf16.mxu0 %v5066_v39  ;;  %v5148_v39 = vld [vmem:[%s6829_s3 + $0x448] ss:$16 sps:$4 sm:$0xff]  }
 0x196   : > { %3676 = vmatpush1.bf16.msra.mxu1 %v5109_v54  ;;  %v5153_v54 = vld [vmem:[%s6829_s3 + $0x464] ss:$16 sps:$4 sm:$0xff]  }
 0x197   : > { %3677 = vmatprep.subr.bf16.mxu1 %v5117_v55  ;;  %v5156_v55 = vld [vmem:[%s6829_s3 + $0x46c] ss:$16 sps:$4 sm:$0xff]  }
 0x198   : > { %3789 = vmatpush1.bf16.msra.mxu0 %v5064_v40  ;;  %v5151_v40 = vld [vmem:[%s6829_s3 + $0x460] ss:$16 sps:$4 sm:$0xff]  }
 0x199   : > { %3790 = vmatprep.subr.bf16.mxu0 %v5072_v56  ;;  %v5154_v56 = vld [vmem:[%s6829_s3 + $0x468] ss:$16 sps:$4 sm:$0xff]  }
 0x19a   : > { %3678 = vmatpush1.bf16.msra.mxu1 %v5115_v41  ;;  %v5159_v41 = vld [vmem:[%s6829_s3 + $0x484] ss:$16 sps:$4 sm:$0xff]  }
 0x19b   : > { %3679 = vmatprep.subr.bf16.mxu1 %v5123_v57  ;;  %v5162_v57 = vld [vmem:[%s6829_s3 + $0x48c] ss:$16 sps:$4 sm:$0xff]  }
 0x19c   : > { %3791 = vmatpush1.bf16.msra.mxu0 %v5070_v58  ;;  %v5157_v58 = vld [vmem:[%s6829_s3 + $0x480] ss:$16 sps:$4 sm:$0xff]  }
 0x19d   : > { %3792 = vmatprep.subr.bf16.mxu0 %v5078_v59  ;;  %v5160_v59 = vld [vmem:[%s6829_s3 + $0x488] ss:$16 sps:$4 sm:$0xff]  }
 0x19e   : > { %3680 = vmatpush1.bf16.msra.mxu1 %v5121_v44  ;;  %v5165_v44 = vld [vmem:[%s6829_s3 + $0x4a4] ss:$16 sps:$4 sm:$0xff]  }
 0x19f   : > { %3681 = vmatprep.subr.bf16.mxu1 %v5129_v60  ;;  %v5168_v60 = vld [vmem:[%s6829_s3 + $0x4ac] ss:$16 sps:$4 sm:$0xff]  }
 0x1a0   : > { %3793 = vmatpush1.bf16.msra.mxu0 %v5076_v61  ;;  %v5163_v61 = vld [vmem:[%s6829_s3 + $0x4a0] ss:$16 sps:$4 sm:$0xff]  }
 0x1a1   : > { %3794 = vmatprep.subr.bf16.mxu0 %v5084_v62  ;;  %v5166_v62 = vld [vmem:[%s6829_s3 + $0x4a8] ss:$16 sps:$4 sm:$0xff]  }
 0x1a2   : > { %3682 = vmatpush1.bf16.msra.mxu1 %v5127_v63  ;;  %v5171_v63 = vld [vmem:[%s6829_s3 + $0x4c4] ss:$16 sps:$4 sm:$0xff]  }
 0x1a3   : > { %3694 = vmatprep.subr.bf16.mxu1 %v5135_v0  ;;  %v5174_v0 = vld [vmem:[%s6829_s3 + $0x4cc] ss:$16 sps:$4 sm:$0xff]  }
 0x1a4   : > { %3795 = vmatpush1.bf16.msra.mxu0 %v5082_v1  ;;  %v5169_v1 = vld [vmem:[%s6829_s3 + $0x4c0] ss:$16 sps:$4 sm:$0xff]  }
 0x1a5   : > { %3796 = vmatprep.subr.bf16.mxu0 %v5090_v2  ;;  %v5172_v2 = vld [vmem:[%s6829_s3 + $0x4c8] ss:$16 sps:$4 sm:$0xff]  }
 0x1a8   : > { %3797 = vmatpush1.bf16.msra.mxu0 %v5088_v3  ;;  %v5177_v3 = vld [vmem:[%s6829_s3 + $0x4e4] ss:$16 sps:$4 sm:$0xff]  }
 0x1a9   : > { %3798 = vmatprep.subr.bf16.mxu0 %v5096_v5  ;;  %v5180_v5 = vld [vmem:[%s6829_s3 + $0x4ec] ss:$16 sps:$4 sm:$0xff]  }
 0x1ac   : > { %3799 = vmatpush1.bf16.msra.mxu0 %v5094_v6  ;;  %v5175_v6 = vld [vmem:[%s6829_s3 + $0x4e0] ss:$16 sps:$4 sm:$0xff]  }
 0x1ad   : > { %3800 = vmatprep.subr.bf16.mxu0 %v5102_v8  ;;  %v5178_v8 = vld [vmem:[%s6829_s3 + $0x4e8] ss:$16 sps:$4 sm:$0xff]  }
 0x1b0   : > { %3801 = vmatpush1.bf16.msra.mxu0 %v5100_v9  ;;  %v5183_v9 = vld [vmem:[%s6829_s3 + $0x504] ss:$16 sps:$4 sm:$0xff]  }
 0x1b1   : > { %3802 = vmatprep.subr.bf16.mxu0 %v5108_v10  ;;  %v5186_v10 = vld [vmem:[%s6829_s3 + $0x50c] ss:$16 sps:$4 sm:$0xff]  }
 0x1b4   : > { %3803 = vmatpush1.bf16.msra.mxu0 %v5106_v12  ;;  %v5181_v12 = vld [vmem:[%s6829_s3 + $0x500] ss:$16 sps:$4 sm:$0xff]  }
 0x1b5   : > { %3804 = vmatprep.subr.bf16.mxu0 %v5114_v13  ;;  %v5184_v13 = vld [vmem:[%s6829_s3 + $0x508] ss:$16 sps:$4 sm:$0xff]  }
 0x1b8   : > { %3805 = vmatpush1.bf16.msra.mxu0 %v5112_v14  ;;  %v5189_v14 = vld [vmem:[%s6829_s3 + $0x524] ss:$16 sps:$4 sm:$0xff]  }
 0x1b9   : > { %3806 = vmatprep.subr.bf16.mxu0 %v5120_v15  ;;  %v5192_v15 = vld [vmem:[%s6829_s3 + $0x52c] ss:$16 sps:$4 sm:$0xff]  }
 0x1bc   : > { %3807 = vmatpush1.bf16.msra.mxu0 %v5118_v16  ;;  %v5187_v16 = vld [vmem:[%s6829_s3 + $0x520] ss:$16 sps:$4 sm:$0xff]  }
 0x1bd   : > { %3808 = vmatprep.subr.bf16.mxu0 %v5126_v17  ;;  %v5190_v17 = vld [vmem:[%s6829_s3 + $0x528] ss:$16 sps:$4 sm:$0xff]  }
 0x1c0   : > { %3809 = vmatpush1.bf16.msra.mxu0 %v5124_v18  ;;  %v5195_v18 = vld [vmem:[%s6829_s3 + $0x544] ss:$16 sps:$4 sm:$0xff]  }
 0x1c1   : > { %3810 = vmatprep.subr.bf16.mxu0 %v5132_v19  ;;  %v5198_v19 = vld [vmem:[%s6829_s3 + $0x54c] ss:$16 sps:$4 sm:$0xff]  }
 0x1c4   : > { %3811 = vmatpush1.bf16.msra.mxu0 %v5130_v20  ;;  %v5193_v20 = vld [vmem:[%s6829_s3 + $0x540] ss:$16 sps:$4 sm:$0xff]  }
 0x1c5   : > { %3823 = vmatprep.subr.bf16.mxu0 %v5138_v21  ;;  %v5196_v21 = vld [vmem:[%s6829_s3 + $0x548] ss:$16 sps:$4 sm:$0xff]  }
 0x1d9   : > { %v2278_v11 = vpop.f32.mrb[4].mxu1 }
 0x1da   : > { %v4439_v50 = vadd.f32 %v2278_v11, %v540_v7  ;;  %v2280_v23 = vpop.f32.mrb[5].mxu1  ;;  %v5199_v11 = vld [vmem:[%s6829_s3 + $0x560] ss:$16 sps:$4 sm:$0xff]  }
 0x1db   : > { %v4440_v34 = vadd.f32 %v2280_v23, %v544_v49  ;;  %v2282_v24 = vpop.f32.mrb[6].mxu1  ;;  %v5207_v23 = vld [vmem:[%s6829_s3 + $0x584] ss:$16 sps:$4 sm:$0xff]  }
 0x1dc   : > { %v4441_v26 = vadd.f32 %v2282_v24, %v540_v7  ;;  %v2284_v27 = vpop.f32.mrb[7].mxu1  ;;  %v2418_v32 = vmax.f32 %v4439_v50, 0.0  ;;  %v5201_v7 = vld [vmem:[%s6829_s3 + $0x564] ss:$16 sps:$4 sm:$0xff]   ;;  %v5202_v50 = vld [vmem:[%s6829_s3 + $0x568] ss:$16 sps:$4 sm:$0xff]  }
 0x1dd   : > { %v4442_v29 = vadd.f32 %v2284_v27, %v544_v49  ;;  %v2419_v35 = vmax.f32 %v4440_v34, 0.0  ;;  %v5204_v49 = vld [vmem:[%s6829_s3 + $0x56c] ss:$16 sps:$4 sm:$0xff]   ;;  %v5205_v24 = vld [vmem:[%s6829_s3 + $0x580] ss:$16 sps:$4 sm:$0xff]  }
 0x1de   : > { %v2424_v33 = vmax.f32 %v4441_v26, 0.0  ;;  %v5210_v34 = vld [vmem:[%s6829_s3 + $0x58c] ss:$16 sps:$4 sm:$0xff]   ;;  %v5208_v26 = vld [vmem:[%s6829_s3 + $0x588] ss:$16 sps:$4 sm:$0xff]  }
 0x1df   : > { %v2425_v36 = vmax.f32 %v4442_v29, 0.0  ;;  %v5213_v27 = vld [vmem:[%s6829_s3 + $0x5a4] ss:$16 sps:$4 sm:$0xff]   ;;  %v5216_v29 = vld [vmem:[%s6829_s3 + $0x5ac] ss:$16 sps:$4 sm:$0xff]  }
 0x1e0   : > { %v2430_v37 = vpack.c.bf16 %v2424_v33, %v2418_v32  ;;  %v547_v32 = vsub.s32 4, %v6314_v25  ;;  %v551_v33 = vsub.s32 5, %v6314_v25 }
 0x1e1   : > { %v2431_v38 = vpack.c.bf16 %v2425_v36, %v2419_v35  ;;  %v5211_v35 = vld [vmem:[%s6829_s3 + $0x5a0] ss:$16 sps:$4 sm:$0xff]   ;;  %v5214_v36 = vld [vmem:[%s6829_s3 + $0x5a8] ss:$16 sps:$4 sm:$0xff]  }
 0x1e3   : > { %3683 = vmatprep.mubr.bf16.mxu1 %v2431_v38  ;;  %3812 = vmatprep.mubr.bf16.mxu0 %v2431_v38  ;;  %v5219_v38 = vld [vmem:[%s6829_s3 + $0x5c4] ss:$16 sps:$4 sm:$0xff]  }
 0x1e4   : > { %3684 = vmatmul.mubr.bf16.vlgmr.msra.gmra.mrb[8].mxu1 %v2430_v37  ;;  %3813 = vmatmul.mubr.bf16.vlgmr.msra.gmra.mrb[8].mxu0 %v2430_v37  ;;  %v548_v37 = vrot.slane %v6329_v30, %v547_v32 }
 0x1e5   : > { %3695 = vmatpush1.bf16.msra.mxu1 %v5133_v42  ;;  %3824 = vmatpush1.bf16.msra.mxu0 %v5136_v43  ;;  %v5222_v42 = vld [vmem:[%s6829_s3 + $0x5cc] ss:$16 sps:$4 sm:$0xff]   ;;  %v552_v43 = vrot.slane %v6329_v30, %v551_v33 }
 0x1e6   : > { %3696 = vmatprep.subr.bf16.mxu1 %v5141_v45  ;;  %3825 = vmatprep.subr.bf16.mxu0 %v5144_v46  ;;  %v5217_v46 = vld [vmem:[%s6829_s3 + $0x5c0] ss:$16 sps:$4 sm:$0xff]   ;;  %v5228_v30 = vld [vmem:[%s6829_s3 + $0x5ec] ss:$16 sps:$4 sm:$0xff]  }
 0x1e9   : > { %3697 = vmatpush1.bf16.msra.mxu1 %v5139_v47  ;;  %3826 = vmatpush1.bf16.msra.mxu0 %v5142_v48  ;;  %v5220_v47 = vld [vmem:[%s6829_s3 + $0x5c8] ss:$16 sps:$4 sm:$0xff]  }
 0x1ea   : > { %3698 = vmatprep.subr.bf16.mxu1 %v5147_v51  ;;  %3827 = vmatprep.subr.bf16.mxu0 %v5150_v52  ;;  %v5225_v52 = vld [vmem:[%s6829_s3 + $0x5e4] ss:$16 sps:$4 sm:$0xff]  }
 0x1ed   : > { %3699 = vmatpush1.bf16.msra.mxu1 %v5145_v53  ;;  %3828 = vmatpush1.bf16.msra.mxu0 %v5148_v39 }
 0x1ee   : > { %3700 = vmatprep.subr.bf16.mxu1 %v5153_v54  ;;  %3829 = vmatprep.subr.bf16.mxu0 %v5156_v55 }
 0x1f1   : > { %3701 = vmatpush1.bf16.msra.mxu1 %v5151_v40  ;;  %3830 = vmatpush1.bf16.msra.mxu0 %v5154_v56  ;;  %v5223_v56 = vld [vmem:[%s6829_s3 + $0x5e0] ss:$16 sps:$4 sm:$0xff]  }
 0x1f2   : > { %3702 = vmatprep.subr.bf16.mxu1 %v5159_v41  ;;  %3831 = vmatprep.subr.bf16.mxu0 %v5162_v57  ;;  %v5226_v41 = vld [vmem:[%s6829_s3 + $0x5e8] ss:$16 sps:$4 sm:$0xff]  }
 0x1f5   : > { %3703 = vmatpush1.bf16.msra.mxu1 %v5157_v58  ;;  %3832 = vmatpush1.bf16.msra.mxu0 %v5160_v59 }
 0x1f6   : > { %3704 = vmatprep.subr.bf16.mxu1 %v5165_v44  ;;  %3833 = vmatprep.subr.bf16.mxu0 %v5168_v60 }
 0x1f9   : > { %3705 = vmatpush1.bf16.msra.mxu1 %v5163_v61  ;;  %3834 = vmatpush1.bf16.msra.mxu0 %v5166_v62  ;;  %v2626_v62 = vld [vmem:[%s6830_s4] sm:$0xf] }
 0x1fa   : > { %3706 = vmatprep.subr.bf16.mxu1 %v5171_v63  ;;  %3835 = vmatprep.subr.bf16.mxu0 %v5174_v0  ;;  %v2631_v63 = vrot.slane %v2626_v62, %v531_v28  ;;  %v2639_v0 = vrot.slane %v2626_v62, %v539_v22 }
 0x1fd   : > { %3707 = vmatpush1.bf16.msra.mxu1 %v5169_v1  ;;  %3836 = vmatpush1.bf16.msra.mxu0 %v5172_v2  ;;  %v2635_v1 = vrot.slane %v2626_v62, %v535_v31  ;;  %v2643_v2 = vrot.slane %v2626_v62, %v543_v4 }
 0x1fe   : > { %3708 = vmatprep.subr.bf16.mxu1 %v5177_v3  ;;  %3837 = vmatprep.subr.bf16.mxu0 %v5180_v5 }
 0x201   : > { %3709 = vmatpush1.bf16.msra.mxu1 %v5175_v6  ;;  %3838 = vmatpush1.bf16.msra.mxu0 %v5178_v8 }
 0x202   : > { %3710 = vmatprep.subr.bf16.mxu1 %v5183_v9  ;;  %3839 = vmatprep.subr.bf16.mxu0 %v5186_v10 }
 0x205   : > { %3711 = vmatpush1.bf16.msra.mxu1 %v5181_v12  ;;  %3840 = vmatpush1.bf16.msra.mxu0 %v5184_v13 }
 0x206   : > { %3712 = vmatprep.subr.bf16.mxu1 %v5189_v14  ;;  %3841 = vmatprep.subr.bf16.mxu0 %v5192_v15 }
 0x209   : > { %3713 = vmatpush1.bf16.msra.mxu1 %v5187_v16  ;;  %3842 = vmatpush1.bf16.msra.mxu0 %v5190_v17 }
 0x20a   : > { %3714 = vmatprep.subr.bf16.mxu1 %v5195_v18  ;;  %3843 = vmatprep.subr.bf16.mxu0 %v5198_v19 }
 0x20d   : > { %3715 = vmatpush1.bf16.msra.mxu1 %v5193_v20  ;;  %3844 = vmatpush1.bf16.msra.mxu0 %v5196_v21 }
 0x20e   : > { %3716 = vmatprep.subr.bf16.mxu1 %v5201_v7  ;;  %3845 = vmatprep.subr.bf16.mxu0 %v5204_v49 }
 0x211   : > { %3717 = vmatpush1.bf16.msra.mxu1 %v5199_v11  ;;  %3846 = vmatpush1.bf16.msra.mxu0 %v5202_v50 }
 0x212   : > { %3718 = vmatprep.subr.bf16.mxu1 %v5207_v23  ;;  %3847 = vmatprep.subr.bf16.mxu0 %v5210_v34 }
 0x215   : > { %3719 = vmatpush1.bf16.msra.mxu1 %v5205_v24  ;;  %3848 = vmatpush1.bf16.msra.mxu0 %v5208_v26 }
 0x216   : > { %3720 = vmatprep.subr.bf16.mxu1 %v5213_v27  ;;  %3849 = vmatprep.subr.bf16.mxu0 %v5216_v29 }
 0x219   : > { %3721 = vmatpush1.bf16.msra.mxu1 %v5211_v35  ;;  %3850 = vmatpush1.bf16.msra.mxu0 %v5214_v36 }
 0x21a   : > { %v2407_v45 = vpop.f32.mrb[4].mxu0  ;;  %3722 = vmatprep.subr.bf16.mxu1 %v5219_v38  ;;  %3851 = vmatprep.subr.bf16.mxu0 %v5222_v42 }
 0x21b   : > { %v4443_v48 = vadd.f32 %v2407_v45, %v548_v37  ;;  %v2409_v51 = vpop.f32.mrb[5].mxu0 }
 0x21c   : > { %v4444_v53 = vadd.f32 %v2409_v51, %v552_v43  ;;  %v2411_v39 = vpop.f32.mrb[6].mxu0 }
 0x21d   : > { %v4445_v54 = vadd.f32 %v2411_v39, %v548_v37  ;;  %v2413_v55 = vpop.f32.mrb[7].mxu0  ;;  %3723 = vmatpush1.bf16.msra.mxu1 %v5217_v46  ;;  %3852 = vmatpush1.bf16.msra.mxu0 %v5220_v47  ;;  %v2420_v57 = vmax.f32 %v4443_v48, 0.0 }
 0x21e   : > { %v4446_v40 = vadd.f32 %v2413_v55, %v552_v43  ;;  %3724 = vmatprep.subr.bf16.mxu1 %v5225_v52  ;;  %3853 = vmatprep.subr.bf16.mxu0 %v5228_v30  ;;  %v2421_v59 = vmax.f32 %v4444_v53, 0.0 }
 0x21f   : > { %v2426_v58 = vmax.f32 %v4445_v54, 0.0 }
 0x220   : > { %v2427_v44 = vmax.f32 %v4446_v40, 0.0 }
 0x221   : > { %v2432_v60 = vpack.c.bf16 %v2426_v58, %v2420_v57  ;;  %3725 = vmatpush1.bf16.msra.mxu1 %v5223_v56  ;;  %3854 = vmatpush1.bf16.msra.mxu0 %v5226_v41 }
 0x222   : > { %v2433_v61 = vpack.c.bf16 %v2427_v44, %v2421_v59 }
 0x224   : > { %3726 = vmatprep.mubr.bf16.mxu1 %v2433_v61  ;;  %3855 = vmatprep.mubr.bf16.mxu0 %v2433_v61 }
 0x225   : > { %3727 = vmatmul.mubr.bf16.vlgmr.msra.gmra.mrb[8].mxu1 %v2432_v60  ;;  %3856 = vmatmul.mubr.bf16.vlgmr.msra.gmra.mrb[8].mxu0 %v2432_v60 }
 0x2f8   : > { %v3728_v3 = vpop.f32.mrb[8].mxu1  ;;  %v3857_v5 = vpop.f32.mrb[8].mxu0 }
 0x2f9   : > { %v4447_v6 = vadd.f32 %v3728_v3, %v2631_v63  ;;  %v4451_v8 = vadd.f32 %v3857_v5, %v2639_v0  ;;  %v3730_v9 = vpop.f32.mrb[9].mxu1  ;;  %v3859_v10 = vpop.f32.mrb[9].mxu0 }
 0x2fa   : > { %v4448_v28 = vadd.f32 %v3730_v9, %v2635_v1  ;;  %v4452_v12 = vadd.f32 %v3859_v10, %v2643_v2  ;;  %v3732_v13 = vpop.f32.mrb[10].mxu1  ;;  %v3861_v22 = vpop.f32.mrb[10].mxu0 }
 0x2fb   : > { %3866 = vst [vmem:[%s231_s27] sm:$0xff] %v4447_v6  ;;  %3868 = vst [vmem:[%s231_s27 + $0x10] sm:$0xff] %v4451_v8  ;;  %v4449_v31 = vadd.f32 %v3732_v13, %v2631_v63  ;;  %v4453_v14 = vadd.f32 %v3861_v22, %v2639_v0  ;;  %v3734_v25 = vpop.f32.mrb[11].mxu1  ;;  %v3863_v4 = vpop.f32.mrb[11].mxu0 }
 0x2fc   : > { %3867 = vst [vmem:[%s231_s27 + $0x8] sm:$0xff] %v4448_v28  ;;  %3869 = vst [vmem:[%s231_s27 + $0x18] sm:$0xff] %v4452_v12  ;;  %v4450_v15 = vadd.f32 %v3734_v25, %v2635_v1  ;;  %v4454_v16 = vadd.f32 %v3863_v4, %v2643_v2 }
 0x2fd   : > { %3870 = vst [vmem:[%s231_s27 + $0x20] sm:$0xff] %v4449_v31  ;;  %3872 = vst [vmem:[%s231_s27 + $0x30] sm:$0xff] %v4453_v14 }
 0x2fe   : > { %3871 = vst [vmem:[%s231_s27 + $0x28] sm:$0xff] %v4450_v15  ;;  %3873 = vst [vmem:[%s231_s27 + $0x38] sm:$0xff] %v4454_v16 }
 0x2ff PF: > { %s15_s18 = sadd.s32 1, %s5239_s18  }
 0x300   : > { %p12_p4 = scmp.ge.s32.totalorder %s15_s18, 5  }
 0x302   :  { %14 = sbr.rel (!%p12_p4) target bundleno = 1 (0x1), region = 70 }

</bundles_post_ra>
